<compile_context>
chip_gen: v7x
topology: tpu7x:2x2x1
jax: 0.10.0
libtpu: 0.0.40
codegen_flags: <defaults>
</compile_context>

<pallas_src>
import numpy as np
import jax
import jax.numpy as jnp
from jax import lax
from jax.experimental import pallas as pl
from jax.experimental.pallas import tpu as pltpu


# ------------------------------ tiling helpers --------------------------------
def _target_rows():
    """MXU-height target for the conv row block: 256 on v6e/v7x, 128 on v5e and
    older chips (their MXUs are 128-tall, so M=256 only raises vreg pressure)."""
    try:
        kind = jax.devices()[0].device_kind.lower()
    except Exception:
        return 128
    for tag in ("v2", "v3", "v4", "v5"):
        if tag in kind:
            return 128
    return 256


def _row_block(H, W, pool, target_m):
    """Largest row block R dividing H with R*W ~ target_m (even R if pooling)."""
    r = max(1, min(H, target_m // max(W, 1)))
    if pool:
        r = max(2, r - (r % 2))
        while r > 2 and H % r:
            r -= 2
        return r if H % r == 0 else 2
    while r > 1 and H % r:
        r -= 1
    return r


# ------------- Conv 3x3, pad=1, stride=1, fused ReLU (+ 2x2 maxpool) ----------
def conv3x3_relu(x, w, b, pool=False):
    """x: (B,H,W,Cin) bf16, w: (3,3,Cin,Cout), b: (Cout,).
    Returns bf16 (B,H,W,Cout), or (B,H//2,W//2,Cout) when pool=True."""
    B, H, W, Cin = x.shape
    Cout = w.shape[-1]
    if pool:
        assert H % 2 == 0 and W % 2 == 0
    # Pad tiny channel counts up to 8 (zero channels contribute nothing).
    if Cin < 8:
        pad_c = 8 - Cin
        x = jnp.pad(x, ((0, 0), (0, 0), (0, 0), (0, pad_c)))
        w = jnp.pad(w, ((0, 0), (0, 0), (0, pad_c), (0, 0)))
        Cin = 8
    # Fuse the three dx taps along the contraction dim: (3, 3*Cin, Cout) bf16.
    wf = w.reshape(3, 3 * Cin, Cout).astype(jnp.bfloat16)
    b2 = b.reshape(1, Cout).astype(jnp.float32)

    R = _row_block(H, W, pool, _target_rows())
    n_rt = H // R
    M = R * W
    Mslab = (R + 2) * W                                # R rows + top/bottom halo
    # Tile Cout so the f32 accumulator is at most (M, 128) (<= 32 vregs @ M=256).
    TN = 128 if (Cout > 128 and Cout % 128 == 0) else Cout
    n_ct = Cout // TN
    Ho, Wo = (H // 2, W // 2) if pool else (H, W)
    Ro = R // 2 if pool else R

    def kernel(x_ref, w_ref, b_ref, o_ref):
        rt = pl.program_id(1)
        r0 = rt * R
        # ---- (R+2, W, Cin) row slab with zeroed H-halo rows (no HBM pad).
        #      Halo/mask math in f32 (no bf16 VALU on v5e); cast to bf16 only
        #      right before the MXU. ----------------------------------------
        top_i = jnp.maximum(r0 - 1, 0)
        bot_i = jnp.minimum(r0 + R, H - 1)
        top = x_ref[0, pl.ds(top_i, 1)].astype(jnp.float32)          # (1,W,Cin)
        bot = x_ref[0, pl.ds(bot_i, 1)].astype(jnp.float32)
        top = jnp.where(rt == 0, jnp.zeros_like(top), top)
        bot = jnp.where(rt == pl.num_programs(1) - 1, jnp.zeros_like(bot), bot)
        mid = x_ref[0, pl.ds(r0, R)].astype(jnp.float32)             # (R,W,Cin)
        slab = jnp.concatenate([top, mid, bot], axis=0)              # (R+2,W,Cin)
        F = slab.reshape(Mslab, Cin)            # rows flattened onto sublanes

        # ---- dx = -1 / +1 taps via XLU roll + column mask (slices stay
        #      sublane-aligned; the wrap across row boundaries is masked). ---
        col = lax.broadcasted_iota(jnp.int32, (Mslab, 1), 0) % W
        zero = jnp.zeros_like(F)
        Fl = jnp.where(col == 0, zero, pltpu.roll(F, 1, axis=0))          # x[h,w-1]
        Fr = jnp.where(col == W - 1, zero,
                       pltpu.roll(F, Mslab - 1, axis=0))                  # x[h,w+1]
        # Fused K operand: [Fl | F | Fr] -> (Mslab, 3*Cin), single bf16 cast.
        Ff = jnp.concatenate([Fl, F, Fr], axis=-1).astype(jnp.bfloat16)

        # ---- 3 matmuls per Cout tile (dx fused along K), f32 accumulation ---
        for ct in range(n_ct):
            n0 = ct * TN
            acc = jnp.zeros((M, TN), jnp.float32)
            for dy in range(3):
                o = dy * W
                acc += jnp.dot(Ff[o:o + M], w_ref[dy, :, n0:n0 + TN],
                               preferred_element_type=jnp.float32)
            acc += b_ref[:, n0:n0 + TN]
            out = jnp.maximum(acc, 0.0)                          # fused ReLU
            if pool:
                # Fused 2x2 max pool: (R,W,TN) -> (R//2,W//2,TN), VPU only.
                v = out.reshape(R // 2, 2, W // 2, 2, TN)
                out = jnp.max(jnp.max(v, axis=3), axis=1)
                o_ref[0, :, :, n0:n0 + TN] = out.astype(o_ref.dtype)
            else:
                o_ref[0, :, :, n0:n0 + TN] = out.reshape(R, W, TN).astype(o_ref.dtype)

    return pl.pallas_call(
        kernel,
        out_shape=jax.ShapeDtypeStruct((B, Ho, Wo, Cout), jnp.bfloat16),
        grid=(B, n_rt),
        in_specs=[
            # Whole image stays VMEM-resident across the row tiles of a batch
            # element (fine at these sizes; bf16 halves residency).
            # TODO(synk): for large H*W on v7x (64 MiB VMEM) switch the input to
            # row-slab blocks with an in-kernel halo fetch.
            pl.BlockSpec((1, H, W, Cin), lambda bi, rt: (bi, 0, 0, 0)),
            pl.BlockSpec((3, 3 * Cin, Cout), lambda bi, rt: (0, 0, 0)),
            pl.BlockSpec((1, Cout), lambda bi, rt: (0, 0)),
        ],
        out_specs=pl.BlockSpec((1, Ro, Wo, Cout), lambda bi, rt: (bi, rt, 0, 0)),
        compiler_params=pltpu.CompilerParams(
            dimension_semantics=("parallel", "parallel")),
    )(x, wf, b2)


# ------------------------ AdaptiveAvgPool2d((7, 7)) --------------------------
def _adaptive_pool_matrix(in_size, out_size):
    # Exact PyTorch adaptive_avg_pool window formula.
    P = np.zeros((out_size, in_size), np.float32)
    for i in range(out_size):
        s = (i * in_size) // out_size
        e = -((-(i + 1) * in_size) // out_size)   # ceil((i+1)*in/out)
        P[i, s:e] = 1.0 / (e - s)
    return P


def adaptive_avgpool_7x7(x):
    """(B,H,W,C) -> (B,7,7,C) f32.  Plain JAX on purpose: the spatial extent is
    tiny here (<= 49 elements), a dedicated pallas_call is launch overhead."""
    B, H, W, C = x.shape
    Ph = jnp.asarray(_adaptive_pool_matrix(H, 7))        # (7, H)
    Pw = jnp.asarray(_adaptive_pool_matrix(W, 7))        # (7, W)
    return jnp.einsum("ih,jw,bhwc->bijc", Ph, Pw, x.astype(jnp.float32))


# -------------------------- Linear (+ activation) -----------------------------
def linear(x, w, b, activation=None):
    """x: (B,K), w: (K,N), b: (N,).  bf16 operand streaming, f32 accumulation
    done directly in the resident output block.  Grid = (N tiles 'parallel',
    K tiles 'arbitrary') so fc1's weight streaming feeds both v7x cores."""
    B, K = x.shape
    N = w.shape[1]
    x = x.astype(jnp.bfloat16)
    w = w.astype(jnp.bfloat16)
    b2 = b.reshape(1, N).astype(jnp.float32)
    tk = K
    for cand in (4096, 2048, 1792, 1024, 896, 512, 256, 128):
        if K % cand == 0:
            tk = cand
            break
    nk = K // tk
    tn = 512 if (N % 512 == 0 and N > 512) else N
    nn = N // tn

    def kernel(x_ref, w_ref, b_ref, o_ref):
        k = pl.program_id(1)

        @pl.when(k == 0)
        def _():
            o_ref[...] = jnp.zeros_like(o_ref)

        o_ref[...] += jnp.dot(x_ref[...], w_ref[...],
                              preferred_element_type=jnp.float32)

        @pl.when(k == nk - 1)
        def _():
            y = o_ref[...] + b_ref[...]
            if activation == "relu":
                y = jnp.maximum(y, 0.0)
            elif activation == "sigmoid":
                y = jax.nn.sigmoid(y)
            o_ref[...] = y

    return pl.pallas_call(
        kernel,
        out_shape=jax.ShapeDtypeStruct((B, N), jnp.float32),
        grid=(nn, nk),
        in_specs=[
            pl.BlockSpec((B, tk), lambda n, k: (0, k)),
            pl.BlockSpec((tk, tn), lambda n, k: (k, n)),
            pl.BlockSpec((1, tn), lambda n, k: (0, n)),
        ],
        out_specs=pl.BlockSpec((B, tn), lambda n, k: (0, n)),
        compiler_params=pltpu.CompilerParams(
            dimension_semantics=("parallel", "arbitrary")),
    )(x, w, b2)


# ------------------------------ VGG19 model ----------------------------------
_CONV_CFG = [(1, 64), (64, 64), (64, 128), (128, 128),
             (128, 256), (256, 256), (256, 256), (256, 256), (256, 256)]
_POOL_AFTER = {1, 3, 7, 8}   # 0-based conv indices followed by MaxPool2d(2,2)


def init_params(key):
    keys = jax.random.split(key, len(_CONV_CFG) + 2)
    convs = []
    for k, (cin, cout) in zip(keys[:len(_CONV_CFG)], _CONV_CFG):
        w = (jax.random.normal(k, (3, 3, cin, cout), jnp.float32)
             * np.sqrt(2.0 / (9 * cin))).astype(jnp.bfloat16)
        convs.append((w, jnp.zeros((cout,), jnp.float32)))
    fc1_w = (jax.random.normal(keys[-2], (256 * 7 * 7, 1024), jnp.float32)
             * np.sqrt(2.0 / (256 * 7 * 7))).astype(jnp.bfloat16)
    fc1_b = jnp.zeros((1024,), jnp.float32)
    fc2_w = (jax.random.normal(keys[-1], (1024, 1), jnp.float32)
             * np.sqrt(1.0 / 1024)).astype(jnp.bfloat16)
    fc2_b = jnp.zeros((1,), jnp.float32)
    return {"convs": convs, "fc1": (fc1_w, fc1_b), "fc2": (fc2_w, fc2_b)}


def vgg19_forward(params, x_nchw):
    # NCHW -> NHWC; bf16 inter-layer activations, f32 accumulation in-kernel.
    x = jnp.transpose(x_nchw, (0, 2, 3, 1)).astype(jnp.bfloat16)
    for i, (w, bcv) in enumerate(params["convs"]):
        x = conv3x3_relu(x, w, bcv, pool=(i in _POOL_AFTER))   # pool fused
    x = adaptive_avgpool_7x7(x)                                 # (B,7,7,C) f32
    B = x.shape[0]
    C = x.shape[-1]
    # PyTorch's x.view(B, -1) flattens NCHW as (C, 7, 7): reorder accordingly.
    x = jnp.transpose(x, (0, 3, 1, 2)).reshape(B, C * 49)
    x = linear(x, *params["fc1"], activation="relu")
    # TODO(synk): nn.Dropout() applied as identity (inference semantics);
    # training-mode random mask / 1/(1-p) scaling is not implemented.
    x = linear(x, *params["fc2"], activation="sigmoid")
    return x


if __name__ == "__main__":
    key = jax.random.PRNGKey(0)
    k_in, k_par = jax.random.split(key)
    # Small 1-channel input (AdaptiveAvgPool guarantees the classifier shape).
    x = jax.random.normal(k_in, (2, 1, 32, 32), jnp.float32)      # PyTorch NCHW
    params = init_params(k_par)
    out = vgg19_forward(params, x)
    out = jax.block_until_ready(out)
    assert out.shape == (2, 1)
    assert bool(jnp.all(jnp.isfinite(out)))
    assert bool(jnp.all((out >= 0.0) & (out <= 1.0)))             # sigmoid range
    print("KERNEL_OK")
</pallas_src>

<mosaic_0001>
module attributes {stable_mosaic.version = 11 : i64} {
  func.func @kernel(%arg0: i32, %arg1: i32, %arg2: memref<1x32x32x8xbf16, #tpu.memory_space<vmem>>, %arg3: memref<3x24x64xbf16, #tpu.memory_space<vmem>>, %arg4: memref<1x64xf32, #tpu.memory_space<vmem>>, %arg5: memref<1x8x32x64xbf16, #tpu.memory_space<vmem>>) attributes {dimension_semantics = [#tpu.dimension_semantics<parallel>, #tpu.dimension_semantics<parallel>], iteration_bounds = array<i64: 2, 4>, scalar_prefetch = 0 : i64, scratch_operands = 0 : i64, tpu.core_type = #tpu.core_type<tc>, window_params = [{transform_indices = @transform_0, window_bounds = array<i64: 1, 32, 32, 8>}, {pipeline_mode = #tpu.pipeline_mode<synchronous>, transform_indices = @transform_1, window_bounds = array<i64: 3, 24, 64>}, {pipeline_mode = #tpu.pipeline_mode<synchronous>, transform_indices = @transform_2, window_bounds = array<i64: 1, 64>}, {transform_indices = @transform_3, window_bounds = array<i64: 1, 8, 32, 64>}]} {
    %c8_i32 = arith.constant 8 : i32
    %0 = arith.muli %arg1, %c8_i32 : i32
    %c1_i32 = arith.constant 1 : i32
    %1 = arith.subi %0, %c1_i32 : i32
    %c0_i32 = arith.constant 0 : i32
    %2 = arith.maxsi %1, %c0_i32 : i32
    %c8_i32_0 = arith.constant 8 : i32
    %3 = arith.addi %0, %c8_i32_0 : i32
    %c31_i32 = arith.constant 31 : i32
    %4 = arith.minsi %3, %c31_i32 : i32
    %c0 = arith.constant 0 : index
    %5 = arith.index_cast %2 : i32 to index
    %c0_1 = arith.constant 0 : index
    %c0_2 = arith.constant 0 : index
    %6 = vector.load %arg2[%c0, %5, %c0_1, %c0_2] : memref<1x32x32x8xbf16, #tpu.memory_space<vmem>>, vector<1x1x32x8xbf16>
    %7 = vector.shape_cast %6 : vector<1x1x32x8xbf16> to vector<1x32x8xbf16>
    %8 = arith.extf %7 : vector<1x32x8xbf16> to vector<1x32x8xf32>
    %c0_3 = arith.constant 0 : index
    %9 = arith.index_cast %4 : i32 to index
    %c0_4 = arith.constant 0 : index
    %c0_5 = arith.constant 0 : index
    %10 = vector.load %arg2[%c0_3, %9, %c0_4, %c0_5] : memref<1x32x32x8xbf16, #tpu.memory_space<vmem>>, vector<1x1x32x8xbf16>
    %11 = vector.shape_cast %10 : vector<1x1x32x8xbf16> to vector<1x32x8xbf16>
    %12 = arith.extf %11 : vector<1x32x8xbf16> to vector<1x32x8xf32>
    %c0_i32_6 = arith.constant 0 : i32
    %13 = arith.cmpi eq, %arg1, %c0_i32_6 : i32
    %cst = arith.constant 0.000000e+00 : f32
    %14 = vector.broadcast %cst : f32 to vector<1x32x8xf32>
    %15 = arith.select %13, %14, %8 : vector<1x32x8xf32>
    %c3_i32 = arith.constant 3 : i32
    %16 = arith.cmpi eq, %arg1, %c3_i32 : i32
    %cst_7 = arith.constant 0.000000e+00 : f32
    %17 = vector.broadcast %cst_7 : f32 to vector<1x32x8xf32>
    %18 = arith.select %16, %17, %12 : vector<1x32x8xf32>
    %c0_8 = arith.constant 0 : index
    %19 = arith.index_cast %0 : i32 to index
    %c0_9 = arith.constant 0 : index
    %c0_10 = arith.constant 0 : index
    %20 = vector.load %arg2[%c0_8, %19, %c0_9, %c0_10] : memref<1x32x32x8xbf16, #tpu.memory_space<vmem>>, vector<1x8x32x8xbf16>
    %21 = vector.shape_cast %20 : vector<1x8x32x8xbf16> to vector<8x32x8xbf16>
    %22 = arith.extf %21 : vector<8x32x8xbf16> to vector<8x32x8xf32>
    %23 = tpu.concatenate %15, %22, %18 in 0 : vector<1x32x8xf32>, vector<8x32x8xf32>, vector<1x32x8xf32> -> vector<10x32x8xf32>
    %24 = vector.shape_cast %23 : vector<10x32x8xf32> to vector<320x8xf32>
    %25 = tpu.iota {dimensions = array<i32: 0>} : vector<320x1xi32>
    %c32_i32 = arith.constant 32 : i32
    %c0_i32_11 = arith.constant 0 : i32
    %26 = arith.cmpi eq, %c32_i32, %c0_i32_11 : i32
    %c1_i32_12 = arith.constant 1 : i32
    %27 = arith.select %26, %c1_i32_12, %c32_i32 : i32
    %28 = vector.broadcast %27 : i32 to vector<320x1xi32>
    %29 = arith.remsi %25, %28 : vector<320x1xi32>
    %c0_i32_13 = arith.constant 0 : i32
    %30 = vector.broadcast %c0_i32_13 : i32 to vector<320x1xi32>
    %31 = arith.cmpi ne, %29, %30 : vector<320x1xi32>
    %c0_i32_14 = arith.constant 0 : i32
    %32 = vector.broadcast %c0_i32_14 : i32 to vector<320x1xi32>
    %33 = arith.cmpi slt, %29, %32 : vector<320x1xi32>
    %c0_i32_15 = arith.constant 0 : i32
    %34 = arith.cmpi slt, %27, %c0_i32_15 : i32
    %35 = vector.broadcast %34 : i1 to vector<320x1xi1>
    %36 = vector.broadcast %35 : vector<320x1xi1> to vector<320x1xi1>
    %37 = arith.xori %33, %36 : vector<320x1xi1>
    %38 = arith.andi %37, %31 : vector<320x1xi1>
    %39 = vector.broadcast %27 : i32 to vector<320x1xi32>
    %40 = arith.addi %29, %39 : vector<320x1xi32>
    %41 = arith.select %38, %40, %29 : vector<320x1xi1>, vector<320x1xi32>
    %cst_16 = arith.constant 0.000000e+00 : f32
    %42 = vector.broadcast %cst_16 : f32 to vector<320x8xf32>
    %c0_i32_17 = arith.constant 0 : i32
    %43 = vector.broadcast %c0_i32_17 : i32 to vector<320x1xi32>
    %44 = arith.cmpi eq, %41, %43 : vector<320x1xi32>
    %c1_i32_18 = arith.constant 1 : i32
    %45 = tpu.dynamic_rotate %24 by %c1_i32_18 dim 0 : vector<320x8xf32>, i32 -> vector<320x8xf32>
    %46 = vector.shape_cast %44 : vector<320x1xi1> to vector<320x1xi1>
    %47 = vector.broadcast %46 : vector<320x1xi1> to vector<320x8xi1>
    %48 = arith.select %47, %42, %45 : vector<320x8xi1>, vector<320x8xf32>
    %c31_i32_19 = arith.constant 31 : i32
    %49 = vector.broadcast %c31_i32_19 : i32 to vector<320x1xi32>
    %50 = arith.cmpi eq, %41, %49 : vector<320x1xi32>
    %c319_i32 = arith.constant 319 : i32
    %51 = tpu.dynamic_rotate %24 by %c319_i32 dim 0 : vector<320x8xf32>, i32 -> vector<320x8xf32>
    %52 = vector.shape_cast %50 : vector<320x1xi1> to vector<320x1xi1>
    %53 = vector.broadcast %52 : vector<320x1xi1> to vector<320x8xi1>
    %54 = arith.select %53, %42, %51 : vector<320x8xi1>, vector<320x8xf32>
    %55 = tpu.concatenate %48, %24, %54 in 1 : vector<320x8xf32>, vector<320x8xf32>, vector<320x8xf32> -> vector<320x24xf32>
    %56 = arith.truncf %55 : vector<320x24xf32> to vector<320x24xbf16>
    %cst_20 = arith.constant 0.000000e+00 : f32
    %57 = vector.broadcast %cst_20 : f32 to vector<256x64xf32>
    %58 = vector.extract_strided_slice %56 {offsets = [0, 0], sizes = [256, 24], strides = [1, 1]} : vector<320x24xbf16> to vector<256x24xbf16>
    %c0_21 = arith.constant 0 : index
    %c0_22 = arith.constant 0 : index
    %c0_23 = arith.constant 0 : index
    %59 = vector.load %arg3[%c0_21, %c0_22, %c0_23] : memref<3x24x64xbf16, #tpu.memory_space<vmem>>, vector<1x24x64xbf16>
    %60 = vector.shape_cast %59 : vector<1x24x64xbf16> to vector<24x64xbf16>
    %cst_24 = arith.constant dense<0.000000e+00> : vector<256x64xf32>
    %61 = tpu.matmul %58, %60, %cst_24 {dimension_numbers = #tpu.dot_dimension_numbers<[1], [0], [0], [1], [0, 0, 1, 1], [], []>} : vector<256x24xbf16>, vector<24x64xbf16>, vector<256x64xf32> -> vector<256x64xf32>
    %62 = arith.addf %57, %61 : vector<256x64xf32>
    %63 = vector.extract_strided_slice %56 {offsets = [32, 0], sizes = [256, 24], strides = [1, 1]} : vector<320x24xbf16> to vector<256x24xbf16>
    %c1 = arith.constant 1 : index
    %c0_25 = arith.constant 0 : index
    %c0_26 = arith.constant 0 : index
    %64 = vector.load %arg3[%c1, %c0_25, %c0_26] : memref<3x24x64xbf16, #tpu.memory_space<vmem>>, vector<1x24x64xbf16>
    %65 = vector.shape_cast %64 : vector<1x24x64xbf16> to vector<24x64xbf16>
    %cst_27 = arith.constant dense<0.000000e+00> : vector<256x64xf32>
    %66 = tpu.matmul %63, %65, %cst_27 {dimension_numbers = #tpu.dot_dimension_numbers<[1], [0], [0], [1], [0, 0, 1, 1], [], []>} : vector<256x24xbf16>, vector<24x64xbf16>, vector<256x64xf32> -> vector<256x64xf32>
    %67 = arith.addf %62, %66 : vector<256x64xf32>
    %68 = vector.extract_strided_slice %56 {offsets = [64, 0], sizes = [256, 24], strides = [1, 1]} : vector<320x24xbf16> to vector<256x24xbf16>
    %c2 = arith.constant 2 : index
    %c0_28 = arith.constant 0 : index
    %c0_29 = arith.constant 0 : index
    %69 = vector.load %arg3[%c2, %c0_28, %c0_29] : memref<3x24x64xbf16, #tpu.memory_space<vmem>>, vector<1x24x64xbf16>
    %70 = vector.shape_cast %69 : vector<1x24x64xbf16> to vector<24x64xbf16>
    %cst_30 = arith.constant dense<0.000000e+00> : vector<256x64xf32>
    %71 = tpu.matmul %68, %70, %cst_30 {dimension_numbers = #tpu.dot_dimension_numbers<[1], [0], [0], [1], [0, 0, 1, 1], [], []>} : vector<256x24xbf16>, vector<24x64xbf16>, vector<256x64xf32> -> vector<256x64xf32>
    %72 = arith.addf %67, %71 : vector<256x64xf32>
    %c0_31 = arith.constant 0 : index
    %c0_32 = arith.constant 0 : index
    %73 = vector.load %arg4[%c0_31, %c0_32] : memref<1x64xf32, #tpu.memory_space<vmem>>, vector<1x64xf32>
    %74 = vector.broadcast %73 : vector<1x64xf32> to vector<256x64xf32>
    %75 = arith.addf %72, %74 : vector<256x64xf32>
    %cst_33 = arith.constant 0.000000e+00 : f32
    %76 = vector.broadcast %cst_33 : f32 to vector<256x64xf32>
    %77 = arith.maximumf %75, %76 : vector<256x64xf32>
    %78 = vector.shape_cast %77 : vector<256x64xf32> to vector<8x32x64xf32>
    %79 = arith.truncf %78 : vector<8x32x64xf32> to vector<8x32x64xbf16>
    %c0_34 = arith.constant 0 : index
    %c0_35 = arith.constant 0 : index
    %c0_36 = arith.constant 0 : index
    %c0_37 = arith.constant 0 : index
    %80 = vector.load %arg5[%c0_34, %c0_35, %c0_36, %c0_37] : memref<1x8x32x64xbf16, #tpu.memory_space<vmem>>, vector<1x8x32x64xbf16>
    %81 = vector.shape_cast %80 : vector<1x8x32x64xbf16> to vector<8x32x64xbf16>
    %82 = vector.shape_cast %79 : vector<8x32x64xbf16> to vector<1x8x32x64xbf16>
    tpu.vector_store %arg5[%c0_34, %c0_35, %c0_36, %c0_37], %82 {strides = array<i32>} : memref<1x8x32x64xbf16, #tpu.memory_space<vmem>>, vector<1x8x32x64xbf16>,
    return
  }
  func.func @transform_0(%arg0: i32, %arg1: i32) -> (i32, i32, i32, i32) {
    %c0_i32 = arith.constant 0 : i32
    %c0_i32_0 = arith.constant 0 : i32
    %c0_i32_1 = arith.constant 0 : i32
    %c0_i32_2 = arith.constant 0 : i32
    return %arg0, %c0_i32, %c0_i32_0, %c0_i32_1 : i32, i32, i32, i32
  }
  func.func @transform_1(%arg0: i32, %arg1: i32) -> (i32, i32, i32) {
    %c0_i32 = arith.constant 0 : i32
    %c0_i32_0 = arith.constant 0 : i32
    %c0_i32_1 = arith.constant 0 : i32
    %c0_i32_2 = arith.constant 0 : i32
    return %c0_i32, %c0_i32_0, %c0_i32_1 : i32, i32, i32
  }
  func.func @transform_2(%arg0: i32, %arg1: i32) -> (i32, i32) {
    %c0_i32 = arith.constant 0 : i32
    %c0_i32_0 = arith.constant 0 : i32
    %c0_i32_1 = arith.constant 0 : i32
    return %c0_i32, %c0_i32_0 : i32, i32
  }
  func.func @transform_3(%arg0: i32, %arg1: i32) -> (i32, i32, i32, i32) {
    %c0_i32 = arith.constant 0 : i32
    %c0_i32_0 = arith.constant 0 : i32
    %c0_i32_1 = arith.constant 0 : i32
    return %arg0, %arg1, %c0_i32, %c0_i32_0 : i32, i32, i32, i32
  }
}

</mosaic_0001>

<bundles_post_ra>
// kernel: tpu_custom_call.1
= control target key start
LH: loop header
LB: loop body
LE: loop exit
PB: predicated region body
PF: predicated region fallthrough
CT: control target
= control target key end

     0   :  { %8 = vsyncpa [#allocation3], 0  ;;  %s4892_s0 = inlined_call_operand.vmem [shape: bf16[2,32,32,8], index: 0, kind: input, shape index: {}]   ;;  %s4893_s1 = inlined_call_operand.vmem [shape: bf16[3,24,64], index: 1, kind: input, shape index: {}]   ;;  %s4894_s2 = inlined_call_operand.vmem [shape: f32[1,64], index: 2, kind: input, shape index: {}]   ;;  %s4895_s3 = inlined_call_operand.hbm [shape: bf16[2,32,32,64], index: 3, kind: output, shape index: {}]  }
   0x1   :  { %10 = vsyncpa [#allocation3 + $0x1], 0  ;;  %s3564_s12 = smov 0   ;;  %s3566_s13 = smov 0  }
   0x2   :  { %s3568_s14 = smov 0   ;;  %s3570_s15 = smov 0  }
   0x3   :  { %s3572_s16 = smov 0   ;;  %s3574_s17 = smov 0  }
   0x4   :  { %s3576_s18 = smov 0   ;;  %s3578_s19 = smov 0  }
   0x5 LB: > { %s2677_s20 = sadd.s32 4294967295, %s3537_s19   ;;  %s2678_s21 = sadd.s32 4294967294, %s3537_s19   ;;  %s3537_s19 = sphi %s3578_s19, %s16_s19   ;;  %s3533_s18 = sphi %s3576_s18, %s4981_s18   ;;  %s3529_s17 = sphi %s3574_s17, %s4980_s17   ;;  %s3525_s16 = sphi %s3572_s16, %s4979_s16   ;;  %s3521_s15 = sphi %s3570_s15, %s4978_s15   ;;  %s3517_s14 = sphi %s3568_s14, %s4977_s14   ;;  %s3513_s13 = sphi %s3566_s13, %s4976_s13   ;;  %s3509_s12 = sphi %s3564_s12, %s4975_s12  }
   0x6   : > { %s25_s22 = sadd.s32 1, %s3529_s17  ;;  %s28_s23 = sadd.s32 1, %s3533_s18 }
   0x7   : > { %p26_p0 = scmp.ge.s32.totalorder %s25_s22, 4  ;;  %p115_p1 = scmp.ne.s32.totalorder %s3517_s14, %s3513_s13 }
   0x8   : > { %p116_p2 = scmp.eq.s32.totalorder %s2677_s20, 7  ;;  %p121_p5 = scmp.ne.s32.totalorder %s3513_s13, %s3509_s12 }
   0x9   : > { %s4983_s22 = smov (%p26_p0, %s25_s22), 0  ;;  %s4985_s23 = smov (!%p26_p0, %s28_s23), %s3533_s18 }
   0xa   : > { %s101_s24 = ssub.s32 %s3529_s17, %s4983_s22  ;;  %p3615_p3 = por %p116_p2, %p115_p1 }
   0xb   : > { %p30_p4 = scmp.ge.s32.totalorder %s4985_s23, 2  ;;  %p122_p6 = scmp.eq.s32.totalorder %s2678_s21, 7 }
   0xc   : > { %p2681_p7 = scmp.ge.s32.totalorder %s3537_s19, 1  ;;  %p154_p9 = scmp.lt.s32.totalorder %s3537_s19, 9 }
   0xd   : > { %s4987_s23 = smov (%p30_p4, %s4985_s23), 0  ;;  %p3624_p8 = por %p122_p6, %p121_p5 }
   0xe   : > { %s100_s27 = ssub.s32 %s3533_s18, %s4987_s23  ;;  %s105_s28 = sadd.s32 1, %s3517_s14 }
   0xf   : > { %s102_s29 = sor.u32 %s101_s24, %s100_s27  ;;  %p155_p10 = pnand %p2681_p7, %p154_p9 }
  0x10   : > { %p103_p11 = scmp.eq.s32.totalorder %s102_s29, 0 }
  0x11   : > { %158 = sbr.rel (%p155_p10) target bundleno = 498 (0x1f2), region = 32 }
  0x12   : > { %s3633_s30 = scalar_select %p103_p11, %s3517_s14, %s105_s28  }
  0x18   : > { %p178_p12 = scmp.lt.s32.totalorder %s3525_s16, 1  ;;  %v297_v0 = vlaneseq  ;;  %s2685_s4 = sshll.u32 %s3521_s15, 3  ;;  %v3437_v36 = vld [vmem:[%s4893_s1 + $0xc] sm:$0xff]   ;;  %v3714_v41 = vld [vmem:[%s4893_s1] sm:$0xff]   ;;  %vm1787_vm13 = vcmask 1043456  }
  0x19   : > { %s2797_s6 = sshll.u32 %s3521_s15, 7  ;;  %s2686_s7 = sadd.s32 4294967295, %s2685_s4  ;;  %2982 = vmatprep.subr.bf16.mxu1 %v3437_v36  ;;  %3018 = vmatprep.subr.bf16.mxu0 %v3714_v41 }
  0x1a   : > { %s179_s5 = scalar_select %p178_p12, %s3525_s16, 1  ;;  %v3638_v1 = vshrl.u32 %v297_v0, 7  ;;  %2983 = vmatpush3.bf16.msra.mxu1 %v3437_v36  ;;  %3019 = vmatpush3.bf16.msra.mxu0 %v3714_v41 }
  0x1b   : > { %p187_p13 = scmp.gt.s32.totalorder %s2686_s7, 0  ;;  %p214_p0 = scmp.eq.s32.totalorder %s3521_s15, 0 }
  0x1c   : > { %s2793_s8 = sshll.u32 %s179_s5, 9  ;;  %v305_v2 = vadd.s32 56, %v3638_v1  ;;  %v301_v6 = vadd.s32 24, %v3638_v1  ;;  %v3658_v7 = vadd.s32 88, %v3638_v1  ;;  %vm1139_vm0 = vcmp.lt.s32.totalorder %v3638_v1, 7  ;;  %s3539_s28 = smov 8  }
  0x1d   : > { %s3646_s11 = scalar_lea.vmem %s4892_s0, %s2793_s8  ;;  %s4989_s7 = smov (!%p187_p13, %s2686_s7), 0  ;;  %v321_v36 = vadd.s32 184, %v3638_v1  ;;  %vm898_vm11 = vcmp.lt.s32.totalorder %v3638_v1, 1 }
  0x1e   : > { %s3650_s20 = scalar_lea.vmem %s3646_s11, %s2797_s6  ;;  %s2794_s21 = sshll.u32 %s4989_s7, 4  ;;  %v391_v12 = vand.u32 31, %v305_v2  ;;  %v363_v18 = vand.u32 31, %v301_v6  ;;  %v419_v19 = vand.u32 31, %v3658_v7  ;;  %v313_v2 = vadd.s32 120, %v3638_v1 }
  0x1f   : > { %v2913_v3 = vld [vmem:[%s3650_s20 + $0x8] sm:$0xff]   ;;  %v2848_v4 = vld [vmem:[%s3650_s20] sm:$0xff]   ;;  %v2914_v5 = vld [vmem:[%s3650_s20 + $0x10] sm:$0xff]   ;;  %s194_s24 = scalar_lea.vmem %s3646_s11, %s2794_s21  ;;  %s3540_s8 = smov 16  }
  0x20   : > { %v3660_v8 = vunpack.c.l.bf16 %v2913_v3  ;;  %v3662_v9 = vunpack.c.h.bf16 %v2913_v3  ;;  %v3664_v10 = vunpack.c.l.bf16 %v2848_v4  ;;  %v3666_v11 = vunpack.c.h.bf16 %v2848_v4  ;;  %v2911_v16 = vld [vmem:[%s194_s24 + $0x8] sm:$0xff]   ;;  %s215_s27 = scalar_select %p214_p0, 1, 0  ;;  %v2832_v17 = vld [vmem:[%s194_s24] sm:$0xff]   ;;  %v2915_v28 = vld [vmem:[%s3650_s20 + $0x18] sm:$0xff]  }
  0x21   : > { %v3672_v14 = vunpack.c.l.bf16 %v2914_v5  ;;  %v2837_v20 = vunpack.c.l.bf16 %v2911_v16  ;;  %v2838_v21 = vunpack.c.h.bf16 %v2911_v16  ;;  %v2833_v22 = vunpack.c.l.bf16 %v2832_v17  ;;  %v2916_v54 = vld [vmem:[%s3650_s20 + $0x20] sm:$0xff]   ;;  %v2917_v61 = vld [vmem:[%s3650_s20 + $0x28] sm:$0xff]   ;;  %v2918_v62 = vld [vmem:[%s3650_s20 + $0x30] sm:$0xff]   ;;  %s3785_s9 = sadd.s32 8, %s2685_s4  ;;  %p222_p2 = scmp.eq.s32.totalorder %s3521_s15, 3 }
  0x22   : > { %v3242_v13 = vpack.i.bf16 %v3662_v9, %v3660_v8  ;;  %v3237_v15 = vpack.i.bf16 %v3666_v11, %v3664_v10  ;;  %v2834_v23 = vunpack.c.h.bf16 %v2832_v17  ;;  %v216_v24 = vstv %s215_s27  ;;  %p190_p1 = scmp.lt.s32.totalorder %s3785_s9, 31  ;;  %s175_s7 = sand.u32 1, %s3513_s13  }
  0x23   : > { %v1103_v25 = vrot.slane %v3664_v10, 1  ;;  %v1104_v26 = vrot.slane %v3666_v11, 1  ;;  %vm3683_vm1 = vcmp.eq.s32.totalorder %v391_v12, 31  ;;  %vm217_vm2 = vcmp.eq.s32.totalorder %v216_v24, 1  ;;  %s4840_s5 = scalar_lea.sflag [#allocation3], %s175_s7  ;;  %s3541_s6 = smov [#allocation2]  }
  0x24   : > { %3243 = vrot.lane.b32.xlu1 %v3242_v13, %s3539_s28  ;;  %3238 = vrot.lane.b32.xlu0 %v3237_v15, %s3539_s28  ;;  %v1105_v29 = vrot.slane %v3660_v8, 1  ;;  %v1106_v30 = vrot.slane %v3662_v9, 1  ;;  %v1107_v31 = vrot.slane %v3672_v14, 1  ;;  %v3691_v32 = vsel %vm217_vm2, 0.0, %v2837_v20  ;;  %s4991_s9 = smov (!%p190_p1, %s3785_s9), 31 }
  0x25   : > { %v3693_v33 = vsel %vm217_vm2, 0.0, %v2838_v21  ;;  %v3695_v34 = vsel %vm217_vm2, 0.0, %v2833_v22  ;;  %v3697_v35 = vsel %vm217_vm2, 0.0, %v2834_v23  ;;  %vm3705_vm3 = vcmp.eq.s32.totalorder %v363_v18, 31  ;;  %s2795_s4 = sshll.u32 %s4991_s9, 4 }
  0x26   : > { %v1102_v37 = vrot.slane %v3693_v33, 1  ;;  %v3252_v38 = vpack.i.bf16 %v3693_v33, %v3691_v32  ;;  %v3709_v40 = vunpack.c.l.bf16 %v2915_v28  ;;  %v1101_v42 = vrot.slane %v3691_v32, 1  ;;  %s3911_s10 = scalar_lea.vmem %s3646_s11, %s2795_s4  ;;  %s2682_s4 = sshll.u32 %s175_s7, 7 }
  0x27   : > { %v1100_v43 = vrot.slane %v3697_v35, 1  ;;  %v3247_v44 = vpack.i.bf16 %v3697_v35, %v3695_v34  ;;  %v3720_v45 = vunpack.c.h.bf16 %v2915_v28  ;;  %v1099_v46 = vrot.slane %v3695_v34, 1  ;;  %s223_s11 = scalar_select %p222_p2, 1, 0 }
  0x28   : > { %3253 = vrot.lane.b32.xlu1 %v3252_v38, %s3539_s28  ;;  %v1173_v47 = vsel %vm1139_vm0, %v1104_v26, %v1105_v29  ;;  %v1174_v48 = vsel %vm1139_vm0, %v1103_v25, %v1104_v26  ;;  %v3728_v49 = vunpack.c.h.bf16 %v2914_v5  ;;  %v1171_v52 = vsel %vm1139_vm0, %v1106_v30, %v1107_v31 }
  0x29   : > { %3248 = vrot.lane.b32.xlu0 %v3247_v44, %s3539_s28  ;;  %v3257_v50 = vpack.i.bf16 %v1173_v47, %v1174_v48  ;;  %v1177_v51 = vsel %vm1139_vm0, %v1100_v43, %v1101_v42  ;;  %v1172_v53 = vsel %vm1139_vm0, %v1105_v29, %v1106_v30  ;;  %v1178_v55 = vsel %vm1139_vm0, %v1099_v46, %v1100_v43  ;;  %v2919_v29 = vld [vmem:[%s3650_s20 + $0x38] sm:$0xff]   ;;  %v2920_v30 = vld [vmem:[%s3650_s20 + $0x40] sm:$0xff]   ;;  %v2921_v44 = vld [vmem:[%s3650_s20 + $0x48] sm:$0xff]  }
  0x2a   : > { %v1267_v56 = vsel %vm3683_vm1, 0.0, %v1171_v52  ;;  %v1175_v57 = vsel %vm1139_vm0, %v1102_v37, %v1103_v25  ;;  %v1176_v58 = vsel %vm1139_vm0, %v1101_v42, %v1102_v37  ;;  %v3267_v59 = vpack.i.bf16 %v1177_v51, %v1178_v55  ;;  %v2922_v47 = vld [vmem:[%s3650_s20 + $0x50] sm:$0xff]  }
  0x2b   : > { %v1263_v60 = vsel %vm3705_vm3, 0.0, %v1175_v57  ;;  %v3262_v63 = vpack.i.bf16 %v1267_v56, %v1172_v53  ;;  %v3757_v0 = vunpack.c.l.bf16 %v2916_v54  ;;  %vm3761_vm4 = vcmp.eq.s32.totalorder %v419_v19, 31 }
  0x2c   : > { %3258 = vrot.lane.b32.xlu1 %v3257_v50, %s3540_s8  ;;  %v3272_v3 = vpack.i.bf16 %v1263_v60, %v1176_v58  ;;  %v1109_v5 = vrot.slane %v3709_v40, 1  ;;  %v1110_v6 = vrot.slane %v3720_v45, 1  ;;  %v1108_v12 = vrot.slane %v3728_v49, 1 }
  0x2d   : > { %3268 = vrot.lane.b32.xlu0 %v3267_v59, %s3540_s8  ;;  %v1111_v7 = vrot.slane %v3757_v0, 1  ;;  %v3769_v13 = vunpack.c.h.bf16 %v2917_v61  ;;  %v3771_v15 = vunpack.c.l.bf16 %v2918_v62  ;;  %v3774_v16 = vadd.s32 152, %v3638_v1 }
  0x2e   : > { %v3282_v17 = vpack.i.bf16 %v3720_v45, %v3709_v40  ;;  %v3277_v18 = vpack.i.bf16 %v3728_v49, %v3672_v14  ;;  %v447_v20 = vand.u32 31, %v313_v2  ;;  %v1168_v21 = vsel %vm1139_vm0, %v1109_v5, %v1110_v6 }
  0x2f   : > { %v1167_v19 = vsel %vm1139_vm0, %v1110_v6, %v1111_v7  ;;  %v3792_v23 = vunpack.c.l.bf16 %v2917_v61  ;;  %v3794_v24 = vunpack.c.h.bf16 %v2916_v54  ;;  %v1169_v25 = vsel %vm1139_vm0, %v1108_v12, %v1109_v5 }
  0x30   : > { %3263 = vrot.lane.b32.xlu1 %v3262_v63, %s3540_s8  ;;  %v1271_v22 = vsel %vm3761_vm4, 0.0, %v1167_v19  ;;  %v1170_v26 = vsel %vm1139_vm0, %v1107_v31, %v1108_v12  ;;  %v1114_v27 = vrot.slane %v3769_v13, 1  ;;  %v1115_v28 = vrot.slane %v3771_v15, 1 }
  0x31   : > { %3273 = vrot.lane.b32.xlu0 %v3272_v3, %s3540_s8  ;;  %v3808_v37 = vadd.s32 216, %v3638_v1  ;;  %v3811_v38 = vadd.s32 248, %v3638_v1  ;;  %v3292_v31 = vpack.i.bf16 %v1271_v22, %v1168_v21  ;;  %v475_v43 = vand.u32 31, %v3774_v16 }
  0x32   : > { %v3287_v50 = vpack.i.bf16 %v1169_v25, %v1170_v26  ;;  %vm3822_vm5 = vcmp.eq.s32.totalorder %v447_v20, 31  ;;  %v1113_v52 = vrot.slane %v3792_v23, 1  ;;  %v1163_v53 = vsel %vm1139_vm0, %v1114_v27, %v1115_v28  ;;  %v2923_v25 = vld [vmem:[%s3650_s20 + $0x58] sm:$0xff]   ;;  %v3876_v26 = vld [vmem:[%s3650_s20 + $0x60] sm:$0xff]  }
  0x33   : > { %v1112_v54 = vrot.slane %v3794_v24, 1  ;;  %v3832_v55 = vunpack.c.h.bf16 %v2919_v29  ;;  %v3834_v56 = vunpack.c.l.bf16 %v2920_v30  ;;  %v3838_v59 = vunpack.c.h.bf16 %v2921_v44 }
  0x34   : > { %3283 = vrot.lane.b32.xlu1 %v3282_v17, %s3539_s28  ;;  %v3840_v60 = vunpack.c.l.bf16 %v2922_v47  ;;  %v3302_v63 = vpack.i.bf16 %v3769_v13, %v3792_v23  ;;  %v3851_v2 = vunpack.c.l.bf16 %v2919_v29  ;;  %v3853_v3 = vunpack.c.h.bf16 %v2918_v62 }
  0x35   : > { %3278 = vrot.lane.b32.xlu0 %v3277_v18, %s3539_s28  ;;  %v3297_v4 = vpack.i.bf16 %v3794_v24, %v3757_v0  ;;  %v1164_v5 = vsel %vm1139_vm0, %v1113_v52, %v1114_v27  ;;  %v1275_v6 = vsel %vm3822_vm5, 0.0, %v1163_v53  ;;  %v3862_v12 = vunpack.c.l.bf16 %v2921_v44  ;;  %v2927_v27 = vld [vmem:[%s3650_s20 + $0x78] sm:$0xff]  }
  0x36   : > { %v1165_v16 = vsel %vm1139_vm0, %v1112_v54, %v1113_v52  ;;  %v1166_v62 = vsel %vm1139_vm0, %v1111_v7, %v1112_v54  ;;  %v1118_v17 = vrot.slane %v3832_v55, 1  ;;  %v1119_v18 = vrot.slane %v3834_v56, 1 }
  0x37   : > { %v3870_v19 = vunpack.c.h.bf16 %v2920_v30  ;;  %v503_v20 = vand.u32 31, %v321_v36  ;;  %v1122_v21 = vrot.slane %v3838_v59, 1  ;;  %v1123_v22 = vrot.slane %v3840_v60, 1 }
  0x38   : > { %3293 = vrot.lane.b32.xlu1 %v3292_v31, %s3540_s8  ;;  %v3312_v7 = vpack.i.bf16 %v1275_v6, %v1164_v5  ;;  %v1117_v29 = vrot.slane %v3851_v2, 1  ;;  %v1116_v30 = vrot.slane %v3853_v3, 1  ;;  %v3307_v31 = vpack.i.bf16 %v1165_v16, %v1166_v62 }
  0x39   : > { %3288 = vrot.lane.b32.xlu0 %v3287_v50, %s3540_s8  ;;  %v3322_v44 = vpack.i.bf16 %v3832_v55, %v3851_v2  ;;  %v1121_v50 = vrot.slane %v3862_v12, 1  ;;  %vm3888_vm6 = vcmp.eq.s32.totalorder %v475_v43, 31  ;;  %v1159_v52 = vsel %vm1139_vm0, %v1118_v17, %v1119_v18 }
  0x3a   : > { %v3894_v53 = vunpack.c.h.bf16 %v2923_v25  ;;  %v3897_v54 = vunpack.c.l.bf16 %v3876_v26  ;;  %vm3899_vm7 = vcmp.eq.s32.totalorder %v503_v20, 31  ;;  %v1155_v43 = vsel %vm1139_vm0, %v1122_v21, %v1123_v22 }
  0x3b   : > { %v3908_v5 = vunpack.c.l.bf16 %v2923_v25  ;;  %v3317_v6 = vpack.i.bf16 %v3853_v3, %v3771_v15  ;;  %v1161_v16 = vsel %vm1139_vm0, %v1116_v30, %v1117_v29  ;;  %v1162_v62 = vsel %vm1139_vm0, %v1115_v28, %v1116_v30 }
  0x3c   : > { %3303 = vrot.lane.b32.xlu1 %v3302_v63, %s3539_s28  ;;  %v3923_v20 = vunpack.c.h.bf16 %v2922_v47  ;;  %v1160_v25 = vsel %vm1139_vm0, %v1117_v29, %v1118_v17  ;;  %v3342_v36 = vpack.i.bf16 %v3838_v59, %v3862_v12  ;;  %v1156_v57 = vsel %vm1139_vm0, %v1121_v50, %v1122_v21  ;;  %v2840_v29 = vld [vmem:[%s3911_s10] sm:$0xff]  }
  0x3d   : > { %3298 = vrot.lane.b32.xlu0 %v3297_v4, %s3539_s28  ;;  %v1120_v4 = vrot.slane %v3870_v19, 1  ;;  %v1283_v28 = vsel %vm3899_vm7, 0.0, %v1155_v43  ;;  %v531_v47 = vand.u32 31, %v3808_v37  ;;  %v1126_v30 = vrot.slane %v3894_v53, 1 }
  0x3e   : > { %v4896_v17 = vrot.slane %v3897_v54, 1  ;;  %v3337_v63 = vpack.i.bf16 %v3870_v19, %v3834_v56  ;;  %v1124_v43 = vrot.slane %v3923_v20, 1  ;;  %v2842_v42 = vunpack.c.h.bf16 %v2840_v29 }
  0x3f   : > { %v3943_v51 = vsel %vm1139_vm0, %v1120_v4, %v1121_v50  ;;  %v3947_v21 = vsel %vm1139_vm0, %v1119_v18, %v1120_v4  ;;  %v3957_v50 = vunpack.c.l.bf16 %v2927_v27  ;;  %v3352_v18 = vpack.i.bf16 %v1283_v28, %v1156_v57 }
  0x40   : > { %3313 = vrot.lane.b32.xlu1 %v3312_v7, %s3540_s8  ;;  %v1279_v7 = vsel %vm3888_vm6, 0.0, %v1159_v52  ;;  %v1125_v52 = vrot.slane %v3908_v5, 1  ;;  %vm3968_vm8 = vcmp.eq.s32.totalorder %v531_v47, 31  ;;  %v1151_v57 = vsel %vm1139_vm0, %v1126_v30, %v4896_v17 }
  0x41   : > { %3308 = vrot.lane.b32.xlu0 %v3307_v31, %s3540_s8  ;;  %v3327_v31 = vpack.i.bf16 %v1161_v16, %v1162_v62  ;;  %v3332_v37 = vpack.i.bf16 %v1279_v7, %v1160_v25  ;;  %v2925_v16 = vld [vmem:[%s3650_s20 + $0x68] sm:$0xff]   ;;  %v3962_v62 = vunpack.c.h.bf16 %v2927_v27  ;;  %v3347_v25 = vpack.i.bf16 %v3943_v51, %v3947_v21  ;;  %v3989_v7 = vld [vmem:[%s3650_s20 + $0x70] sm:$0xff]   ;;  %s2789_s20 = sshll.u32 %s3525_s16, 7 }
  0x42   : > { %v1152_v27 = vsel %vm1139_vm0, %v1125_v52, %v1126_v30  ;;  %v3980_v28 = vunpack.c.h.bf16 %v2925_v16  ;;  %v224_v51 = vstv %s223_s11  ;;  %v2912_v21 = vld [vmem:[%s3911_s10 + $0x8] sm:$0xff]   ;;  %v3986_v47 = vsel %vm1139_vm0, %v1124_v43, %v1125_v52  ;;  %s4728_s10 = scalar_lea.vmem [#allocation2], %s2682_s4  ;;  %s2830_s11 = sshll.u32 %s3521_s15, 5 }
  0x43   : > { %vm3991_vm9 = vcmp.eq.s32.totalorder %v224_v51, 1  ;;  %v333_v30 = vadd.s32 280, %v3638_v1  ;;  %v4897_v17 = vrot.slane %v3957_v50, 1  ;;  %v4004_v52 = vsel %vm1139_vm0, %v1123_v22, %v1124_v43  ;;  %s2592_s15 = sadd.s32 %s2830_s11, %s2789_s20  ;;  %s2595_s21 = sshll.u32 %s4728_s10, 4  ;;  %s4830_s21 = int_to_ptr.vmem [resolvable:$true] %s2595_s21 }
  0x44   : > { %3323 = vrot.lane.b32.xlu1 %v3322_v44, %s3539_s28  ;;  %v2841_v44 = vunpack.c.l.bf16 %v2840_v29  ;;  %v1134_v51 = vrot.slane %v3962_v62, 1  ;;  %v4013_v61 = vunpack.c.h.bf16 %v3876_v26  ;;  %v2846_v43 = vunpack.c.h.bf16 %v2912_v21  ;;  %s2790_s16 = sshll.u32 %s2592_s15, 6 }
  0x45   : > { %3318 = vrot.lane.b32.xlu0 %v3317_v6, %s3539_s28  ;;  %v3978_v6 = vunpack.c.l.bf16 %v2925_v16  ;;  %v1287_v16 = vsel %vm3968_vm8, 0.0, %v1151_v57  ;;  %v587_v58 = vand.u32 31, %v333_v30  ;;  %v4016_v57 = vunpack.c.l.bf16 %v3989_v7  ;;  %s4828_s29 = scalar_lea.hbm %s4895_s3, %s2790_s16 }
  0x46   : > { %v1144_v22 = vsel %vm1139_vm0, %v4897_v17, %v1134_v51  ;;  %v4029_v26 = vsel %vm3991_vm9, 0.0, %v2842_v42  ;;  %v3372_v30 = vpack.i.bf16 %v1287_v16, %v1152_v27  ;;  %v559_v39 = vand.u32 31, %v3811_v38 }
  0x47   : > { %vm1094_vm10 = vcmp.eq.s32.totalorder %v587_v58, 31  ;;  %v337_v42 = vadd.s32 312, %v3638_v1  ;;  %v4922_v27 = vrot.slane %v3693_v33, 7  ;;  %vm1620_vm1 = vcmask 64512  }
  0x48   : > { %3333 = vrot.lane.b32.xlu1 %v3332_v37, %s3540_s8  ;;  %v4008_v37 = vsel %vm3991_vm9, 0.0, %v2841_v44  ;;  %v4921_v44 = vrot.slane %v3666_v11, 7  ;;  %vm4140_vm14 = vcmp.eq.s32.totalorder %v559_v39, 31  ;;  %vm1661_vm2 = vcmask 130048  }
  0x49   : > { %3328 = vrot.lane.b32.xlu0 %v3327_v31, %s3540_s8  ;;  %v1135_v48 = vrot.slane %v4008_v37, 1  ;;  %v2845_v31 = vunpack.c.l.bf16 %v2912_v21  ;;  %v1136_v21 = vrot.slane %v4029_v26, 1  ;;  %v615_v4 = vand.u32 31, %v337_v42 }
  0x4a   : > { %vm1738_vm3 = vcmask 195584  }
  0x4b   : > { %v1143_v29 = vsel %vm1139_vm0, %v1134_v51, %v1135_v48  ;;  %v4038_v58 = vsel %vm3991_vm9, 0.0, %v2845_v31  ;;  %v4042_v51 = vsel %vm3991_vm9, 0.0, %v2846_v43  ;;  %v4053_v31 = vsel %vm1139_vm0, %v1135_v48, %v1136_v21 }
  0x4c   : > { %3343 = vrot.lane.b32.xlu1 %v3342_v36, %s3539_s28  ;;  %v1295_v17 = vsel %vm1094_vm10, 0.0, %v1143_v29  ;;  %v1138_v16 = vrot.slane %v4042_v51, 1  ;;  %v4917_v43 = vrot.slane %v3662_v9, 7  ;;  %v4918_v29 = vrot.slane %v3660_v8, 7 }
  0x4d   : > { %3338 = vrot.lane.b32.xlu0 %v3337_v63, %s3539_s28  ;;  %v4034_v36 = vpack.i.bf16 %v1295_v17, %v1144_v22  ;;  %v1130_v63 = vrot.slane %v3980_v28, 1  ;;  %v1137_v17 = vrot.slane %v4038_v58, 1  ;;  %v3439_v22 = vld [vmem:[%s4893_s1 + $0x14] ss:$0 sps:$4 sm:$0xff]   ;;  %vm1098_vm12 = vcmp.eq.s32.totalorder %v615_v4, 31 }
  0x4e   : > { %v4070_v48 = vsel %vm898_vm11, %v4918_v29, %v4917_v43  ;;  %v4920_v42 = vmov %v4918_v29  ;;  %v4091_v43 = vld [vmem:[%s4893_s1 + $0x8] ss:$0 sps:$4 sm:$0xff]   ;;  %3158 = vmatprep.subr.msk.bf16.mxu1 %vm1787_vm13, %v3439_v22  ;;  %v4930_v4 = vrot.slane %v3664_v10, 7  ;;  %v4936_v10 = vrot.slane %v3697_v35, 7 }
  0x4f   : > { %4919 = vst [vmem:[#allocation5_spill] sm:$0xff] %v4070_v48  ;;  %4925 = vst [vmem:[#allocation7_spill] sm:$0xff] %v4091_v43  ;;  %v4095_v8 = vsel %vm1139_vm0, %v1136_v21, %v1137_v17  ;;  %v4928_v21 = vpack.i.bf16 %v3894_v53, %v3908_v5  ;;  %3159 = vmatprep.subr.msk.bf16.mxu0 %vm1787_vm13, %v4091_v43 }
  0x50   : > { %3353 = vrot.lane.b32.xlu1 %v3352_v18, %s3540_s8  ;;  %v1179_v18 = vsel %vm1139_vm0, %v1138_v16, %v1099_v46  ;;  %v4923_v46 = vrot.slane %v3691_v32, 7  ;;  %v1128_v32 = vrot.slane %v4013_v61, 1 }
  0x51   : > { %3348 = vrot.lane.b32.xlu0 %v3347_v25, %s3540_s8  ;;  %v4078_v25 = vsel %vm898_vm11, %v4921_v44, %v4920_v42  ;;  %v1140_v44 = vsel %vm1139_vm0, %v1137_v17, %v1138_v16  ;;  %v4927_v42 = vrot.slane %v3697_v35, 7  ;;  %v1299_v48 = vsel %vm1098_vm12, 0.0, %v1179_v18 }
  0x52   : > { %v4086_v38 = vsel %vm898_vm11, %v4923_v46, %v4922_v27  ;;  %v4926_v29 = vmov %v4923_v46  ;;  %v1129_v46 = vrot.slane %v3978_v6, 1  ;;  %v4115_v16 = vpack.i.bf16 %v1299_v48, %v1140_v44 }
  0x53   : > { %4924 = vst [vmem:[#allocation6_spill] sm:$0xff] %v4086_v38  ;;  %v4105_v27 = vsel %vm898_vm11, %v4927_v42, %v4926_v29  ;;  %v4929_v17 = vrot.slane %v3666_v11, 7  ;;  %v4931_v18 = vmov %v4930_v4  ;;  %v4932_v42 = vrot.slane %v3693_v33, 7 }
  0x54   : > { %3363 = vrot.lane.b32.xlu1 %v4928_v21, %s3539_s28  ;;  %v4933_v48 = vpack.i.bf16 %v3923_v20, %v3840_v60  ;;  %v3382_v11 = vpack.i.bf16 %v3980_v28, %v3978_v6  ;;  %v4937_v33 = vrot.slane %v3695_v34, 7  ;;  %v4940_v35 = vrot.slane %v4016_v57, 1 }
  0x55   : > { %v4124_v29 = vsel %vm898_vm11, %v4930_v4, %v4929_v17  ;;  %v4132_v21 = vsel %vm898_vm11, %v4932_v42, %v4931_v18  ;;  %v4939_v18 = vrot.slane %v4042_v51, 7  ;;  %v4165_v42 = vld [vmem:[%s4893_s1 + $0x18] sm:$0xff]   ;;  %v4174_v34 = vsel %vm1787_vm13, %v4091_v43, 0 }
  0x56   : > { %3358 = vrot.lane.b32.xlu0 %v4933_v48, %s3539_s28  ;;  %v4152_v17 = vsel %vm898_vm11, %v4937_v33, %v4936_v10  ;;  %v4938_v4 = vmov %v4937_v33  ;;  %v1147_v48 = vsel %vm1139_vm0, %v1130_v63, %v4940_v35  ;;  %v1789_v10 = vsel %vm1787_vm13, %v3439_v22, 0  ;;  %3021 = vmatpush3.bf16.msra.mxu0 %v4174_v34 }
  0x57   : > { %v4160_v39 = vsel %vm898_vm11, %v4939_v18, %v4938_v4  ;;  %v867_v33 = vrot.slane %v3728_v49, 7  ;;  %v3377_v4 = vpack.i.bf16 %v4013_v61, %v3897_v54  ;;  %v4180_v18 = vunpack.c.h.bf16 %v3989_v7  ;;  %2985 = vmatpush3.bf16.msra.mxu1 %v1789_v10  ;;  %3054 = vmatprep.subr.bf16.mxu0 %v4165_v42 }
  0x58   : > { %v868_v38 = vrot.slane %v3709_v40, 7  ;;  %v869_v35 = vrot.slane %v3720_v45, 7  ;;  %3373 = vrot.lane.b32.xlu1 %v3372_v30, %s3540_s8  ;;  %v1149_v22 = vsel %vm1139_vm0, %v1128_v32, %v1129_v46  ;;  %v4941_v49 = vrot.slane %v3897_v54, 1  ;;  %3090 = vmatprep.subr.bf16.mxu1 %v3714_v41 }
  0x59   : > { %v866_v7 = vrot.slane %v3672_v14, 7  ;;  %v871_v10 = vrot.slane %v3794_v24, 7  ;;  %v4942_v40 = vpack.i.bf16 %v3986_v47, %v4004_v52  ;;  %v1148_v45 = vsel %vm1139_vm0, %v1129_v46, %v1130_v63 }
  0x5a   : > { %v1150_v43 = vsel %vm1139_vm0, %v4941_v49, %v1128_v32  ;;  %v1291_v30 = vsel %vm4140_vm14, 0.0, %v1147_v48  ;;  %v4205_v32 = vsel %vm898_vm11, %v868_v38, %v869_v35  ;;  %v4209_v14 = vsel %vm898_vm11, %v867_v33, %v868_v38 }
  0x5b   : > { %3368 = vrot.lane.b32.xlu0 %v4942_v40, %s3540_s8  ;;  %v4214_v24 = vsel %vm898_vm11, %v866_v7, %v867_v33  ;;  %v4943_v47 = vrot.slane %v3662_v9, 7  ;;  %v872_v63 = vrot.slane %v3792_v23, 7  ;;  %v873_v46 = vrot.slane %v3769_v13, 7 }
  0x5c   : > { %v3387_v44 = vpack.i.bf16 %v1149_v22, %v1150_v43  ;;  %v870_v38 = vrot.slane %v3757_v0, 7  ;;  %v875_v48 = vrot.slane %v3853_v3, 7  ;;  %3383 = vrot.lane.b32.xlu1 %v3382_v11, %s3539_s28  ;;  %v3392_v49 = vpack.i.bf16 %v1291_v30, %v1148_v45 }
  0x5d   : > { %v4220_v52 = vsel %vm898_vm11, %v4943_v47, %v866_v7  ;;  %v4229_v33 = vsel %vm898_vm11, %v872_v63, %v873_v46  ;;  %v4233_v9 = vsel %vm898_vm11, %v871_v10, %v872_v63  ;;  %v876_v23 = vrot.slane %v3851_v2, 7 }
  0x5e   : > { %v1132_v13 = vrot.slane %v4180_v18, 1  ;;  %v4240_v0 = vsel %vm898_vm11, %v870_v38, %v871_v10  ;;  %v4244_v3 = vsel %vm898_vm11, %v869_v35, %v870_v38  ;;  %v877_v43 = vrot.slane %v3832_v55, 7 }
  0x5f   : > { %3378 = vrot.lane.b32.xlu0 %v3377_v4, %s3539_s28  ;;  %v4249_v11 = vsel %vm898_vm11, %v875_v48, %v876_v23  ;;  %v874_v2 = vrot.slane %v3771_v15, 7  ;;  %v879_v22 = vrot.slane %v3870_v19, 7  ;;  %v880_v7 = vrot.slane %v3862_v12, 7 }
  0x60   : > { %v4254_v4 = vsel %vm898_vm11, %v876_v23, %v877_v43  ;;  %3393 = vrot.lane.b32.xlu1 %v3392_v49, %s3540_s8  ;;  %v3402_v35 = vpack.i.bf16 %v3962_v62, %v3957_v50  ;;  %v3397_v55 = vpack.i.bf16 %v4180_v18, %v4016_v57  ;;  %v4944_v12 = vrot.slane %v3957_v50, 1 }
  0x61   : > { %v4265_v10 = vsel %vm898_vm11, %v874_v2, %v875_v48  ;;  %v4269_v15 = vsel %vm898_vm11, %v873_v46, %v874_v2  ;;  %v881_v40 = vrot.slane %v3838_v59, 7  ;;  %v4279_v45 = vsel %vm898_vm11, %v879_v22, %v880_v7 }
  0x62   : > { %v1145_v19 = vsel %vm1139_vm0, %v1132_v13, %v4944_v12  ;;  %v878_v30 = vrot.slane %v3834_v56, 7  ;;  %v4945_v47 = vrot.slane %v4016_v57, 1  ;;  %v883_v46 = vrot.slane %v3923_v20, 7 }
  0x63   : > { %3388 = vrot.lane.b32.xlu0 %v3387_v44, %s3540_s8  ;;  %v884_v44 = vrot.slane %v3908_v5, 7  ;;  %v885_v38 = vrot.slane %v3894_v53, 7  ;;  %v4291_v59 = vsel %vm898_vm11, %v880_v7, %v881_v40  ;;  %v882_v49 = vrot.slane %v3840_v60, 7 }
  0x64   : > { %v1146_v63 = vsel %vm1139_vm0, %v4945_v47, %v1132_v13  ;;  %v4295_v48 = vsel %vm898_vm11, %v878_v30, %v879_v22  ;;  %3403 = vrot.lane.b32.xlu1 %v3402_v35, %s3539_s28  ;;  %v4300_v56 = vsel %vm898_vm11, %v877_v43, %v878_v30  ;;  %v887_v23 = vrot.slane %v4013_v61, 7 }
  0x65   : > { %v4304_v20 = vsel %vm898_vm11, %v884_v44, %v885_v38  ;;  %v4308_v53 = vsel %vm898_vm11, %v883_v46, %v884_v44  ;;  %v3407_v5 = vpack.i.bf16 %v1145_v19, %v1146_v63  ;;  %v888_v13 = vrot.slane %v3978_v6, 7 }
  0x66   : > { %v889_v43 = vrot.slane %v3980_v28, 7  ;;  %v4317_v2 = vsel %vm898_vm11, %v882_v49, %v883_v46  ;;  %v4321_v22 = vsel %vm898_vm11, %v881_v40, %v882_v49  ;;  %v886_v60 = vrot.slane %v3897_v54, 7 }
  0x67   : > { %3398 = vrot.lane.b32.xlu0 %v3397_v55, %s3539_s28  ;;  %v4325_v7 = vsel %vm898_vm11, %v887_v23, %v888_v13  ;;  %v3422_v6 = vpack.i.bf16 %v4042_v51, %v4038_v58  ;;  %v891_v61 = vrot.slane %v4180_v18, 7  ;;  %v3417_v35 = vpack.i.bf16 %v4029_v26, %v4008_v37 }
  0x68   : > { %3413 = vrot.lane.b32.xlu1 %v4034_v36, %s3540_s8  ;;  %v4334_v28 = vsel %vm898_vm11, %v888_v13, %v889_v43  ;;  %v4342_v54 = vsel %vm898_vm11, %v886_v60, %v887_v23  ;;  %v4346_v36 = vsel %vm898_vm11, %v885_v38, %v886_v60  ;;  %v892_v55 = vrot.slane %v3957_v50, 7 }
  0x69   : > { %v893_v12 = vrot.slane %v3962_v62, 7  ;;  %v890_v19 = vrot.slane %v4016_v57, 7  ;;  %v895_v62 = vrot.slane %v4029_v26, 7  ;;  %v896_v57 = vrot.slane %v4038_v58, 7 }
  0x6a   : > { %v4353_v18 = vsel %vm898_vm11, %v891_v61, %v892_v55  ;;  %v4946_v47 = vpack.i.bf16 %v4095_v8, %v4053_v31  ;;  %v894_v63 = vrot.slane %v4008_v37, 7  ;;  %v4947_v46 = vrot.slane %v4042_v51, 7 }
  0x6b   : > { %3408 = vrot.lane.b32.xlu0 %v3407_v5, %s3540_s8  ;;  %v4358_v40 = vsel %vm898_vm11, %v892_v55, %v893_v12  ;;  %v4362_v30 = vsel %vm898_vm11, %v890_v19, %v891_v61  ;;  %v4366_v50 = vsel %vm898_vm11, %v889_v43, %v890_v19  ;;  %v4386_v26 = vsel %vm898_vm11, %v895_v62, %v896_v57 }
  0x6c   : > { %3423 = vrot.lane.b32.xlu1 %v3422_v6, %s3539_s28  ;;  %v4382_v44 = vsel %vm898_vm11, %v896_v57, %v4947_v46  ;;  %4948 = vst [vmem:[#allocation8_spill] sm:$0xff] %v4386_v26  ;;  %v4390_v58 = vsel %vm898_vm11, %v894_v63, %v895_v62  ;;  %v4394_v31 = vsel %vm898_vm11, %v893_v12, %v894_v63  ;;  %v302_v37 = vadd.s32 32, %v3638_v1 }
  0x6d   : > { %4949 = vst [vmem:[#allocation9_spill] sm:$0xff] %v4390_v58  ;;  %v342_v38 = vand.u32 31, %v3638_v1  ;;  %v306_v57 = vadd.s32 64, %v3638_v1  ;;  %vm2545_vm12 = vcmask 519168  }
  0x6f   : > { %3418 = vrot.lane.b32.xlu0 %v3417_v35, %s3539_s28  ;;  %vm4402_vm0 = vcmp.eq.s32.totalorder %v342_v38, 0  ;;  %s3443_s28 = scalar_lea.vmem %s4830_s21, 2048 }
  0x70   : > { %3433 = vrot.lane.b32.xlu1 %v4115_v16, %s3540_s8  ;;  %v370_v16 = vand.u32 31, %v302_v37  ;;  %v1019_v62 = vsel %vm4402_vm0, 0.0, %v4160_v39  ;;  %p3444_p4 = scmp.ne.s32.totalorder %s4830_s21, %s3443_s28 }
  0x72   : > { %vm4398_vm15 = vcmp.eq.s32.totalorder %v370_v16, 0  ;;  %p3445_p5 = pnand %p3444_p4, %p3615_p3 }
  0x73   : > { %3428 = vrot.lane.b32.xlu0 %v4946_v47, %s3540_s8  ;;  %v1023_v6 = vsel %vm4398_vm15, 0.0, %v4132_v21  ;;  %s3447_s8 = sshll.u32 %s3541_s6, 4  ;;  %s3448_s8 = int_to_ptr.vmem [resolvable:$false] %s3447_s8 }
  0x74   : > { %p3446_p6 = pneg %p3445_p5  ;;  %s3449_s9 = scalar_lea.vmem %s3448_s8, 4096 }
  0x75   : > { %p3450_p7 = scmp.lt.s32.totalorder %s4830_s21, %s3448_s8  ;;  %p3451_p9 = scmp.lt.s32.totalorder %s3449_s9, %s3443_s28 }
  0x77   : > { %p3452_p10 = por %p3451_p9, %p3450_p7 }
  0x79   : > { %p3453_p11 = pnand %p3452_p10, %p3446_p6 }
  0x96   : > { %v3244_v8 = vpop.permute.xlu1 %3243  ;;  %v3239_v51 = vpop.permute.xlu0 %3238 }
  0x97   : > { %v3241_v23 = vunpack.i.h.bf16 %v3239_v51  ;;  %v3240_v13 = vunpack.i.l.bf16 %v3239_v51  ;;  %v3246_v55 = vunpack.i.h.bf16 %v3244_v8  ;;  %v3245_v12 = vunpack.i.l.bf16 %v3244_v8 }
  0x99   : > { %v1625_v37 = vsel %vm1620_vm1, %v1023_v6, %v3240_v13  ;;  %v1626_v21 = vsel %vm1620_vm1, %v4124_v29, %v3241_v23 }
  0x9a   : > { %v3254_v49 = vpop.permute.xlu1 %3253 }
  0x9b   : > { %v3249_v43 = vpop.permute.xlu0 %3248  ;;  %v3256_v51 = vunpack.i.h.bf16 %v3254_v49  ;;  %v3255_v16 = vunpack.i.l.bf16 %v3254_v49 }
  0x9c   : > { %v3251_v61 = vunpack.i.h.bf16 %v3249_v43  ;;  %v3250_v35 = vunpack.i.l.bf16 %v3249_v43 }
  0x9e   : > { %v3259_v19 = vpop.permute.xlu1 %3258  ;;  %v1621_v39 = vsel %vm1620_vm1, %v1019_v62, %v3250_v35  ;;  %v1622_v60 = vsel %vm1620_vm1, %v4152_v17, %v3251_v61  ;;  %v1623_v17 = vsel %vm1620_vm1, %v4105_v27, %v3255_v16  ;;  %v4955_v61 = vld [vmem:[#allocation6_spill] sm:$0xff]  ;;  %v3442_v16 = vld [vmem:[%s4893_s1 + $0x20] ss:$0 sps:$4 sm:$0xff]  }
  0x9f   : > { %v3261_v47 = vunpack.i.h.bf16 %v3259_v19  ;;  %v3260_v63 = vunpack.i.l.bf16 %v3259_v19  ;;  %v3269_v46 = vpop.permute.xlu0 %3268 }
  0xa0   : > { %v3271_v38 = vunpack.i.h.bf16 %v3269_v46  ;;  %v3270_v5 = vunpack.i.l.bf16 %v3269_v46  ;;  %v398_v46 = vand.u32 31, %v306_v57 }
  0xa1   : > { %v1666_v8 = vsel %vm1661_vm2, %v1625_v37, %v3260_v63  ;;  %v1667_v43 = vsel %vm1661_vm2, %v1626_v21, %v3261_v47  ;;  %v1627_v63 = vsel %vm1620_vm1, %v4078_v25, %v3245_v12  ;;  %v4954_v47 = vld [vmem:[#allocation5_spill] sm:$0xff]  ;;  %v1624_v21 = vsel %vm1620_vm1, %v4955_v61, %v3256_v51 }
  0xa2   : > { %v3264_v19 = vpop.permute.xlu1 %3263  ;;  %v1704_v58 = vpack.c.bf16 %v1667_v43, %v1666_v8  ;;  %v1662_v13 = vsel %vm1661_vm2, %v1621_v39, %v3270_v5  ;;  %v1663_v6 = vsel %vm1661_vm2, %v1622_v60, %v3271_v38  ;;  %v1628_v35 = vsel %vm1620_vm1, %v4954_v47, %v3246_v55  ;;  %v4958_v47 = vld [vmem:[#allocation7_spill] sm:$0xff] }
  0xa3   : > { %v3266_v29 = vunpack.i.h.bf16 %v3264_v19  ;;  %v3265_v23 = vunpack.i.l.bf16 %v3264_v19  ;;  %v3274_v49 = vpop.permute.xlu0 %3273  ;;  %v1702_v26 = vpack.c.bf16 %v1663_v6, %v1662_v13  ;;  %vm4437_vm4 = vcmp.eq.s32.totalorder %v398_v46, 0 }
  0xa4   : > { %v3276_v62 = vunpack.i.h.bf16 %v3274_v49  ;;  %v3275_v37 = vunpack.i.l.bf16 %v3274_v49  ;;  %2986 = vmatprep.mubr.msk.bf16.mxu1 %vm1738_vm3, %v1704_v58  ;;  %v310_v51 = vadd.s32 96, %v3638_v1  ;;  %v1027_v13 = vsel %vm4437_vm4, 0.0, %v4220_v52 }
  0xa5   : > { %v1669_v38 = vsel %vm1661_vm2, %v1628_v35, %v3266_v29  ;;  %v1668_v57 = vsel %vm1661_vm2, %v1627_v63, %v3265_v23  ;;  %3022 = vmatprep.mubr.msk.bf16.mxu0 %vm1738_vm3, %v1702_v26  ;;  %v2151_v63 = vsel %vm1787_vm13, %v3442_v16, 0 }
  0xa6   : > { %v1705_v25 = vpack.c.bf16 %v1669_v38, %v1668_v57  ;;  %v1665_v12 = vsel %vm1661_vm2, %v1624_v21, %v3276_v62  ;;  %v1664_v55 = vsel %vm1661_vm2, %v1623_v17, %v3275_v37  ;;  %v3284_v5 = vpop.permute.xlu1 %3283  ;;  %v426_v46 = vand.u32 31, %v310_v51 }
  0xa7   : > { %v1703_v8 = vpack.c.bf16 %v1665_v12, %v1664_v55  ;;  %v3279_v27 = vpop.permute.xlu0 %3278  ;;  %v3286_v39 = vunpack.i.h.bf16 %v3284_v5  ;;  %v3285_v26 = vunpack.i.l.bf16 %v3284_v5  ;;  %v314_v12 = vadd.s32 128, %v3638_v1 }
  0xa8   : > { %2987 = vmatmul.mubr.msk.bf16.vlgmr.msra.gmra.mrb[0].mxu1 %vm1738_vm3, %v1705_v25  ;;  %v3281_v60 = vunpack.i.h.bf16 %v3279_v27  ;;  %v3280_v19 = vunpack.i.l.bf16 %v3279_v27  ;;  %vm4473_vm5 = vcmp.eq.s32.totalorder %v426_v46, 0 }
  0xa9   : > { %3023 = vmatmul.mubr.msk.bf16.vlgmr.msra.gmra.mrb[0].mxu0 %vm1738_vm3, %v1703_v8  ;;  %3092 = vmatpush3.bf16.msra.mxu1 %v3714_v41  ;;  %v1632_v41 = vsel %vm1620_vm1, %v4205_v32, %v3286_v39  ;;  %v1631_v52 = vsel %vm1620_vm1, %v4209_v14, %v3285_v26  ;;  %v1031_v43 = vsel %vm4473_vm5, 0.0, %v4244_v3  ;;  %v454_v26 = vand.u32 31, %v314_v12 }
  0xaa   : > { %3026 = vmatprep.mubr.msk.bf16.mxu0 %vm1738_vm3, %v1704_v58  ;;  %3055 = vmatpush3.bf16.msra.mxu0 %v4165_v42  ;;  %v3294_v6 = vpop.permute.xlu1 %3293  ;;  %v1630_v35 = vsel %vm1620_vm1, %v4214_v24, %v3281_v60  ;;  %v1629_v62 = vsel %vm1620_vm1, %v1027_v13, %v3280_v19 }
  0xab   : > { %v3296_v29 = vunpack.i.h.bf16 %v3294_v6  ;;  %v3295_v23 = vunpack.i.l.bf16 %v3294_v6  ;;  %v3289_v49 = vpop.permute.xlu0 %3288  ;;  %3161 = vmatprep.subr.msk.bf16.mxu0 %vm1787_vm13, %v3442_v16  ;;  %3160 = vmatprep.subr.msk.bf16.mxu1 %vm1787_vm13, %v4958_v47  ;;  %vm4503_vm6 = vcmp.eq.s32.totalorder %v454_v26, 0 }
  0xac   : > { %v3291_v58 = vunpack.i.h.bf16 %v3289_v49  ;;  %v3290_v42 = vunpack.i.l.bf16 %v3289_v49 }
  0xad   : > { %v1672_v37 = vsel %vm1661_vm2, %v1631_v52, %v3295_v23  ;;  %v1673_v17 = vsel %vm1661_vm2, %v1632_v41, %v3296_v29  ;;  %3093 = vmatpush3.bf16.msra.mxu1 %v4174_v34  ;;  %v318_v41 = vadd.s32 160, %v3638_v1 }
  0xae   : > { %v4467_v61 = vpack.c.bf16 %v1673_v17, %v1672_v37  ;;  %v1670_v32 = vsel %vm1661_vm2, %v1629_v62, %v3290_v42  ;;  %v1671_v21 = vsel %vm1661_vm2, %v1630_v35, %v3291_v58  ;;  %v3304_v14 = vpop.permute.xlu1 %3303  ;;  %3057 = vmatpush3.bf16.msra.mxu0 %v2151_v63  ;;  %v1035_v62 = vsel %vm4503_vm6, 0.0, %v4269_v15 }
  0xaf   : > { %v4471_v38 = vpack.c.bf16 %v1671_v21, %v1670_v32  ;;  %v3299_v57 = vpop.permute.xlu0 %3298  ;;  %v3306_v55 = vunpack.i.h.bf16 %v3304_v14  ;;  %v3305_v5 = vunpack.i.l.bf16 %v3304_v14  ;;  %v482_v14 = vand.u32 31, %v318_v41 }
  0xb0   : > { %v3301_v34 = vunpack.i.h.bf16 %v3299_v57  ;;  %v3300_v8 = vunpack.i.l.bf16 %v3299_v57 }
  0xb1   : > { %2990 = vmatprep.mubr.msk.bf16.mxu1 %vm1738_vm3, %v4471_v38  ;;  %3027 = vmatmul.mubr.msk.bf16.gmra.mrb[4].mxu0 %vm1738_vm3, %v1705_v25  ;;  %v1636_v60 = vsel %vm1620_vm1, %v4229_v33, %v3306_v55  ;;  %v1635_v25 = vsel %vm1620_vm1, %v4233_v9, %v3305_v5  ;;  %vm4534_vm7 = vcmp.eq.s32.totalorder %v482_v14, 0 }
  0xb2   : > { %2991 = vmatmul.mubr.msk.bf16.gmra.mrb[4].mxu1 %vm1738_vm3, %v4467_v61  ;;  %3030 = vmatprep.mubr.msk.bf16.mxu0 %vm1738_vm3, %v4471_v38  ;;  %v3314_v27 = vpop.permute.xlu1 %3313  ;;  %v1634_v3 = vsel %vm1620_vm1, %v4240_v0, %v3301_v34  ;;  %v1633_v6 = vsel %vm1620_vm1, %v1031_v43, %v3300_v8 }
  0xb3   : > { %v3316_v51 = vunpack.i.h.bf16 %v3314_v27  ;;  %v3315_v16 = vunpack.i.l.bf16 %v3314_v27  ;;  %v3309_v39 = vpop.permute.xlu0 %3308 }
  0xb4   : > { %v3311_v19 = vunpack.i.h.bf16 %v3309_v39  ;;  %v3310_v13 = vunpack.i.l.bf16 %v3309_v39  ;;  %v322_v39 = vadd.s32 192, %v3638_v1 }
  0xb5   : > { %v1676_v29 = vsel %vm1661_vm2, %v1635_v25, %v3315_v16  ;;  %v1677_v23 = vsel %vm1661_vm2, %v1636_v60, %v3316_v51 }
  0xb6   : > { %v4497_v49 = vpack.c.bf16 %v1677_v23, %v1676_v29  ;;  %v1674_v46 = vsel %vm1661_vm2, %v1633_v6, %v3310_v13  ;;  %v1675_v33 = vsel %vm1661_vm2, %v1634_v3, %v3311_v19  ;;  %v3324_v63 = vpop.permute.xlu1 %3323  ;;  %v1039_v13 = vsel %vm4534_vm7, 0.0, %v4300_v56 }
  0xb7   : > { %v4501_v47 = vpack.c.bf16 %v1675_v33, %v1674_v46  ;;  %v3319_v0 = vpop.permute.xlu0 %3318  ;;  %v3326_v52 = vunpack.i.h.bf16 %v3324_v63  ;;  %v3325_v58 = vunpack.i.l.bf16 %v3324_v63  ;;  %v510_v46 = vand.u32 31, %v322_v39 }
  0xb8   : > { %v3321_v42 = vunpack.i.h.bf16 %v3319_v0  ;;  %v3320_v35 = vunpack.i.l.bf16 %v3319_v0 }
  0xb9   : > { %2994 = vmatprep.mubr.msk.bf16.mxu1 %vm1738_vm3, %v4501_v47  ;;  %3031 = vmatmul.mubr.msk.bf16.gmra.mrb[8].mxu0 %vm1738_vm3, %v4467_v61  ;;  %v1640_v24 = vsel %vm1620_vm1, %v4254_v4, %v3326_v52  ;;  %v1639_v57 = vsel %vm1620_vm1, %v4249_v11, %v3325_v58  ;;  %vm4565_vm8 = vcmp.eq.s32.totalorder %v510_v46, 0 }
  0xba   : > { %2995 = vmatmul.mubr.msk.bf16.gmra.mrb[8].mxu1 %vm1738_vm3, %v4497_v49  ;;  %3034 = vmatprep.mubr.msk.bf16.mxu0 %vm1738_vm3, %v4501_v47  ;;  %v3334_v37 = vpop.permute.xlu1 %3333  ;;  %v1638_v15 = vsel %vm1620_vm1, %v4265_v10, %v3321_v42  ;;  %v1637_v5 = vsel %vm1620_vm1, %v1035_v62, %v3320_v35 }
  0xbb   : > { %v3336_v17 = vunpack.i.h.bf16 %v3334_v37  ;;  %v3335_v32 = vunpack.i.l.bf16 %v3334_v37  ;;  %v3329_v21 = vpop.permute.xlu0 %3328  ;;  %v326_v37 = vadd.s32 224, %v3638_v1 }
  0xbc   : > { %v3331_v12 = vunpack.i.h.bf16 %v3329_v21  ;;  %v3330_v55 = vunpack.i.l.bf16 %v3329_v21 }
  0xbd   : > { %v1680_v34 = vsel %vm1661_vm2, %v1639_v57, %v3335_v32  ;;  %v1681_v8 = vsel %vm1661_vm2, %v1640_v24, %v3336_v17  ;;  %v1043_v24 = vsel %vm4565_vm8, 0.0, %v4321_v22 }
  0xbe   : > { %v4528_v43 = vpack.c.bf16 %v1681_v8, %v1680_v34  ;;  %v1678_v27 = vsel %vm1661_vm2, %v1637_v5, %v3330_v55  ;;  %v1679_v4 = vsel %vm1661_vm2, %v1638_v15, %v3331_v12  ;;  %v3344_v51 = vpop.permute.xlu1 %3343  ;;  %v538_v5 = vand.u32 31, %v326_v37 }
  0xbf   : > { %v4532_v16 = vpack.c.bf16 %v1679_v4, %v1678_v27  ;;  %v3339_v10 = vpop.permute.xlu0 %3338  ;;  %v3346_v26 = vunpack.i.h.bf16 %v3344_v51  ;;  %v3345_v60 = vunpack.i.l.bf16 %v3344_v51 }
  0xc0   : > { %v3341_v25 = vunpack.i.h.bf16 %v3339_v10  ;;  %v3340_v19 = vunpack.i.l.bf16 %v3339_v10  ;;  %vm4596_vm9 = vcmp.eq.s32.totalorder %v538_v5, 0 }
  0xc1   : > { %2998 = vmatprep.mubr.msk.bf16.mxu1 %vm1738_vm3, %v4532_v16  ;;  %3035 = vmatmul.mubr.msk.bf16.gmra.mrb[12].mxu0 %vm1738_vm3, %v4497_v49  ;;  %v1644_v33 = vsel %vm1620_vm1, %v4291_v59, %v3346_v26  ;;  %v1643_v63 = vsel %vm1620_vm1, %v4279_v45, %v3345_v60  ;;  %v330_v60 = vadd.s32 256, %v3638_v1 }
  0xc2   : > { %2999 = vmatmul.mubr.msk.bf16.gmra.mrb[12].mxu1 %vm1738_vm3, %v4528_v43  ;;  %3058 = vmatprep.mubr.msk.bf16.mxu0 %vm1738_vm3, %v4471_v38  ;;  %v3354_v3 = vpop.permute.xlu1 %3353  ;;  %v1642_v56 = vsel %vm1620_vm1, %v4295_v48, %v3341_v25  ;;  %v1641_v41 = vsel %vm1620_vm1, %v1039_v13, %v3340_v19 }
  0xc3   : > { %v3356_v6 = vunpack.i.h.bf16 %v3354_v3  ;;  %v3355_v29 = vunpack.i.l.bf16 %v3354_v3  ;;  %v3349_v23 = vpop.permute.xlu0 %3348 }
  0xc4   : > { %v3351_v9 = vunpack.i.h.bf16 %v3349_v23  ;;  %v3350_v0 = vunpack.i.l.bf16 %v3349_v23 }
  0xc5   : > { %v1684_v38 = vsel %vm1661_vm2, %v1643_v63, %v3355_v29  ;;  %v1685_v52 = vsel %vm1661_vm2, %v1644_v33, %v3356_v6  ;;  %v1047_v6 = vsel %vm4596_vm9, 0.0, %v4346_v36  ;;  %v566_v63 = vand.u32 31, %v330_v60 }
  0xc6   : > { %v4559_v58 = vpack.c.bf16 %v1685_v52, %v1684_v38  ;;  %v1682_v42 = vsel %vm1661_vm2, %v1641_v41, %v3350_v0  ;;  %v1683_v59 = vsel %vm1661_vm2, %v1642_v56, %v3351_v9  ;;  %v3364_v35 = vpop.permute.xlu1 %3363  ;;  %v334_v9 = vadd.s32 288, %v3638_v1 }
  0xc7   : > { %v4563_v62 = vpack.c.bf16 %v1683_v59, %v1682_v42  ;;  %v3366_v17 = vunpack.i.h.bf16 %v3364_v35  ;;  %v3365_v32 = vunpack.i.l.bf16 %v3364_v35  ;;  %vm4628_vm10 = vcmp.eq.s32.totalorder %v566_v63, 0 }
  0xc8   : > { %v3359_v48 = vpop.permute.xlu0 %3358 }
  0xc9   : > { %v3361_v21 = vunpack.i.h.bf16 %v3359_v48  ;;  %v3360_v14 = vunpack.i.l.bf16 %v3359_v48  ;;  %3002 = vmatprep.mubr.msk.bf16.mxu1 %vm1738_vm3, %v4563_v62  ;;  %3059 = vmatmul.mubr.msk.bf16.vlgmr.msra.gmra.mrb[0].mxu0 %vm1738_vm3, %v4467_v61  ;;  %v1648_v34 = vsel %vm1620_vm1, %v4304_v20, %v3366_v17  ;;  %v1647_v61 = vsel %vm1620_vm1, %v4308_v53, %v3365_v32 }
  0xca   : > { %3003 = vmatmul.mubr.msk.bf16.gmra.mrb[16].mxu1 %vm1738_vm3, %v4559_v58  ;;  %3062 = vmatprep.mubr.msk.bf16.mxu0 %vm1738_vm3, %v4501_v47  ;;  %v3374_v57 = vpop.permute.xlu1 %3373  ;;  %v594_v48 = vand.u32 31, %v334_v9 }
  0xcb   : > { %v3376_v12 = vunpack.i.h.bf16 %v3374_v57  ;;  %v3375_v55 = vunpack.i.l.bf16 %v3374_v57  ;;  %v1646_v22 = vsel %vm1620_vm1, %v4317_v2, %v3361_v21  ;;  %v1645_v4 = vsel %vm1620_vm1, %v1043_v24, %v3360_v14 }
  0xcc   : > { %v1051_v14 = vsel %vm4628_vm10, 0.0, %v4366_v50  ;;  %vm4643_vm11 = vcmp.eq.s32.totalorder %v594_v48, 0 }
  0xcd   : > { %v3369_v15 = vpop.permute.xlu0 %3368  ;;  %v1688_v47 = vsel %vm1661_vm2, %v1647_v61, %v3375_v55  ;;  %v1689_v51 = vsel %vm1661_vm2, %v1648_v34, %v3376_v12 }
  0xce   : > { %v3371_v8 = vunpack.i.h.bf16 %v3369_v15  ;;  %v3370_v27 = vunpack.i.l.bf16 %v3369_v15  ;;  %v4590_v11 = vpack.c.bf16 %v1689_v51, %v1688_v47  ;;  %v3384_v39 = vpop.permute.xlu1 %3383 }
  0xcf   : > { %v3386_v25 = vunpack.i.h.bf16 %v3384_v39  ;;  %v3385_v19 = vunpack.i.l.bf16 %v3384_v39 }
  0xd0   : > { %v1686_v10 = vsel %vm1661_vm2, %v1645_v4, %v3370_v27  ;;  %v1687_v20 = vsel %vm1661_vm2, %v1646_v22, %v3371_v8 }
  0xd1   : > { %v4594_v26 = vpack.c.bf16 %v1687_v20, %v1686_v10  ;;  %v3379_v2 = vpop.permute.xlu0 %3378  ;;  %3063 = vmatmul.mubr.msk.bf16.gmra.mrb[4].mxu0 %vm1738_vm3, %v4497_v49  ;;  %v1652_v49 = vsel %vm1620_vm1, %v4334_v28, %v3386_v25  ;;  %v1651_v0 = vsel %vm1620_vm1, %v4325_v7, %v3385_v19  ;;  %v4973_v19 = vld [vmem:[#allocation8_spill] sm:$0xff] }
  0xd2   : > { %v3381_v13 = vunpack.i.h.bf16 %v3379_v2  ;;  %v3380_v3 = vunpack.i.l.bf16 %v3379_v2  ;;  %3066 = vmatprep.mubr.msk.bf16.mxu0 %vm1738_vm3, %v4532_v16  ;;  %v3394_v29 = vpop.permute.xlu1 %3393 }
  0xd3   : > { %3006 = vmatprep.mubr.msk.bf16.mxu1 %vm1738_vm3, %v4594_v26  ;;  %v3396_v23 = vunpack.i.h.bf16 %v3394_v29  ;;  %v3395_v46 = vunpack.i.l.bf16 %v3394_v29 }
  0xd4   : > { %3007 = vmatmul.mubr.msk.bf16.gmra.mrb[20].mxu1 %vm1738_vm3, %v4590_v11  ;;  %v1650_v41 = vsel %vm1620_vm1, %v4342_v54, %v3381_v13  ;;  %v1649_v38 = vsel %vm1620_vm1, %v1047_v6, %v3380_v3 }
  0xd5   : > { %v3389_v33 = vpop.permute.xlu0 %3388  ;;  %v1692_v52 = vsel %vm1661_vm2, %v1651_v0, %v3395_v46  ;;  %v1693_v42 = vsel %vm1661_vm2, %v1652_v49, %v3396_v23 }
  0xd6   : > { %v3391_v36 = vunpack.i.h.bf16 %v3389_v33  ;;  %v3390_v56 = vunpack.i.l.bf16 %v3389_v33  ;;  %v4622_v59 = vpack.c.bf16 %v1693_v42, %v1692_v52  ;;  %v3404_v35 = vpop.permute.xlu1 %3403 }
  0xd7   : > { %v3406_v37 = vunpack.i.h.bf16 %v3404_v35  ;;  %v3405_v17 = vunpack.i.l.bf16 %v3404_v35 }
  0xd8   : > { %v1690_v1 = vsel %vm1661_vm2, %v1649_v38, %v3390_v56  ;;  %v1691_v28 = vsel %vm1661_vm2, %v1650_v41, %v3391_v36 }
  0xd9   : > { %v4626_v45 = vpack.c.bf16 %v1691_v28, %v1690_v1  ;;  %v3399_v54 = vpop.permute.xlu0 %3398  ;;  %3067 = vmatmul.mubr.msk.bf16.gmra.mrb[8].mxu0 %vm1738_vm3, %v4528_v43  ;;  %v1656_v5 = vsel %vm1620_vm1, %v4358_v40, %v3406_v37  ;;  %v1655_v50 = vsel %vm1620_vm1, %v4353_v18, %v3405_v17  ;;  %v4720_v37 = vld [vmem:[%s4894_s2] ss:$0 sm:$0xff] }
  0xda   : > { %v3401_v32 = vunpack.i.h.bf16 %v3399_v54  ;;  %v3400_v21 = vunpack.i.l.bf16 %v3399_v54  ;;  %3070 = vmatprep.mubr.msk.bf16.mxu0 %vm1738_vm3, %v4563_v62  ;;  %v3414_v24 = vpop.permute.xlu1 %3413 }
  0xdb   : > { %3010 = vmatprep.mubr.msk.bf16.mxu1 %vm1738_vm3, %v4626_v45  ;;  %v3416_v57 = vunpack.i.h.bf16 %v3414_v24  ;;  %v3415_v12 = vunpack.i.l.bf16 %v3414_v24 }
  0xdc   : > { %3011 = vmatmul.mubr.msk.bf16.gmra.mrb[24].mxu1 %vm1738_vm3, %v4622_v59  ;;  %v1654_v8 = vsel %vm1620_vm1, %v4362_v30, %v3401_v32  ;;  %v1653_v27 = vsel %vm1620_vm1, %v1051_v14, %v3400_v21  ;;  %v1055_v30 = vsel %vm4643_vm11, 0.0, %v4394_v31  ;;  %v4974_v31 = vld [vmem:[#allocation9_spill] sm:$0xff] }
  0xdd   : > { %v3409_v55 = vpop.permute.xlu0 %3408  ;;  %v1696_v22 = vsel %vm1661_vm2, %v1655_v50, %v3415_v12  ;;  %v1697_v4 = vsel %vm1661_vm2, %v1656_v5, %v3416_v57 }
  0xde   : > { %v3411_v34 = vunpack.i.h.bf16 %v3409_v55  ;;  %v3410_v61 = vunpack.i.l.bf16 %v3409_v55  ;;  %v1719_v47 = vpack.c.bf16 %v1697_v4, %v1696_v22  ;;  %v3424_v40 = vpop.permute.xlu1 %3423 }
  0xdf   : > { %v3426_v18 = vunpack.i.h.bf16 %v3424_v40  ;;  %v3425_v53 = vunpack.i.l.bf16 %v3424_v40 }
  0xe0   : > { %v1694_v51 = vsel %vm1661_vm2, %v1653_v27, %v3410_v61  ;;  %v1695_v10 = vsel %vm1661_vm2, %v1654_v8, %v3411_v34 }
  0xe1   : > { %v1718_v20 = vpack.c.bf16 %v1695_v10, %v1694_v51  ;;  %v3419_v39 = vpop.permute.xlu0 %3418  ;;  %3071 = vmatmul.mubr.msk.bf16.gmra.mrb[12].mxu0 %vm1738_vm3, %v4559_v58  ;;  %v1660_v25 = vsel %vm1620_vm1, %v4382_v44, %v3426_v18  ;;  %v1659_v13 = vsel %vm1620_vm1, %v4973_v19, %v3425_v53 }
  0xe2   : > { %v3421_v2 = vunpack.i.h.bf16 %v3419_v39  ;;  %v3420_v60 = vunpack.i.l.bf16 %v3419_v39  ;;  %3074 = vmatprep.mubr.msk.bf16.mxu0 %vm1738_vm3, %v4594_v26  ;;  %v3434_v3 = vpop.permute.xlu1 %3433 }
  0xe3   : > { %3014 = vmatprep.mubr.msk.bf16.mxu1 %vm1738_vm3, %v1718_v20  ;;  %v3436_v46 = vunpack.i.h.bf16 %v3434_v3  ;;  %v3435_v33 = vunpack.i.l.bf16 %v3434_v3 }
  0xe4   : > { %3015 = vmatmul.mubr.msk.bf16.gmra.mrb[28].mxu1 %vm1738_vm3, %v1719_v47  ;;  %v1658_v6 = vsel %vm1620_vm1, %v4974_v31, %v3421_v2  ;;  %v1657_v29 = vsel %vm1620_vm1, %v1055_v30, %v3420_v60 }
  0xe5   : > { %3038 = vmatprep.mubr.msk.bf16.mxu1 %vm1738_vm3, %v4532_v16  ;;  %v3429_v23 = vpop.permute.xlu0 %3428  ;;  %v1701_v49 = vsel %vm1661_vm2, %v1660_v25, %v3436_v46  ;;  %v1700_v44 = vsel %vm1661_vm2, %v1659_v13, %v3435_v33 }
  0xe6   : > { %v3431_v63 = vunpack.i.h.bf16 %v3429_v23  ;;  %v3430_v9 = vunpack.i.l.bf16 %v3429_v23  ;;  %v1721_v56 = vpack.c.bf16 %v1701_v49, %v1700_v44 }
  0xe8   : > { %v1698_v0 = vsel %vm1661_vm2, %v1657_v29, %v3430_v9  ;;  %v1699_v36 = vsel %vm1661_vm2, %v1658_v6, %v3431_v63 }
  0xe9   : > { %v1720_v16 = vpack.c.bf16 %v1699_v36, %v1698_v0  ;;  %3075 = vmatmul.mubr.msk.bf16.gmra.mrb[16].mxu0 %vm1738_vm3, %v4590_v11 }
  0xea   : > { %3078 = vmatprep.mubr.msk.bf16.mxu0 %vm1738_vm3, %v4626_v45 }
  0xec   : > { %3039 = vmatmul.mubr.msk.bf16.vlgmr.msra.gmra.mrb[16].mxu1 %vm1738_vm3, %v4528_v43 }
  0xed   : > { %3042 = vmatprep.mubr.msk.bf16.mxu1 %vm1738_vm3, %v4563_v62 }
  0xf1   : > { %3079 = vmatmul.mubr.msk.bf16.gmra.mrb[20].mxu0 %vm1738_vm3, %v4622_v59 }
  0xf2   : > { %3082 = vmatprep.mubr.msk.bf16.mxu0 %vm1738_vm3, %v1718_v20 }
  0xf4   : > { %3043 = vmatmul.mubr.msk.bf16.gmra.mrb[20].mxu1 %vm1738_vm3, %v4559_v58 }
  0xf5   : > { %3046 = vmatprep.mubr.msk.bf16.mxu1 %vm1738_vm3, %v4594_v26 }
  0xf9   : > { %3083 = vmatmul.mubr.msk.bf16.gmra.mrb[24].mxu0 %vm1738_vm3, %v1719_v47 }
  0xfa   : > { %3086 = vmatprep.mubr.msk.bf16.mxu0 %vm1738_vm3, %v1720_v16 }
  0xfc   : > { %3047 = vmatmul.mubr.msk.bf16.gmra.mrb[24].mxu1 %vm1738_vm3, %v4590_v11 }
  0xfd   : > { %3050 = vmatprep.mubr.msk.bf16.mxu1 %vm1738_vm3, %v4626_v45 }
 0x101   : > { %3087 = vmatmul.mubr.msk.bf16.gmra.mrb[28].mxu0 %vm1738_vm3, %v1721_v56 }
 0x104   : > { %3051 = vmatmul.mubr.msk.bf16.gmra.mrb[28].mxu1 %vm1738_vm3, %v4622_v59 }
 0x17b   : > { %v2988_v43 = vpop.f32.mrb[0].mxu1 }
 0x17c   : > { %v1825_v58 = vpop.f32.mrb[1].mxu1 }
 0x17d   : > { %v2989_v62 = vpop.f32.mrb[2].mxu1 }
 0x17e   : > { %v1828_v26 = vpop.f32.mrb[3].mxu1 }
 0x185   : > { %v2992_v41 = vpop.f32.mrb[4].mxu1 }
 0x186   : > { %v1841_v38 = vpop.f32.mrb[5].mxu1 }
 0x187   : > { %v2993_v52 = vpop.f32.mrb[6].mxu1 }
 0x188   : > { %v1844_v42 = vpop.f32.mrb[7].mxu1 }
 0x18d   : > { %v2996_v11 = vpop.f32.mrb[8].mxu1 }
 0x18e   : > { %v1857_v1 = vpop.f32.mrb[9].mxu1 }
 0x18f   : > { %v4704_v28 = vpop.f32.mrb[10].mxu1 }
 0x190   : > { %v4706_v35 = vpop.f32.mrb[11].mxu1 }
 0x195   : > { %v4708_v45 = vpop.f32.mrb[12].mxu1 }
 0x196   : > { %v4710_v7 = vpop.f32.mrb[13].mxu1 }
 0x197   : > { %v4712_v59 = vpop.f32.mrb[14].mxu1 }
 0x198   : > { %v4714_v54 = vpop.f32.mrb[15].mxu1 }
 0x19c   : > { %v3060_v48 = vpop.f32.mrb[0].mxu0 }
 0x19d   : > { %v3094_v17 = vadd.f32 %v3060_v48, %v2988_v43  ;;  %v2187_v32 = vpop.f32.mrb[1].mxu0 }
 0x19e   : > { %v3095_v21 = vadd.f32 %v2187_v32, %v1825_v58  ;;  %v3061_v14 = vpop.f32.mrb[2].mxu0 }
 0x19f   : > { %v2355_v24 = vadd.f32 %v3094_v17, %v4720_v37  ;;  %v3096_v57 = vadd.f32 %v3061_v14, %v2989_v62  ;;  %v2190_v12 = vpop.f32.mrb[3].mxu0 }
 0x1a0   : > { %v2353_v55 = vadd.f32 %v3095_v21, %v4720_v37  ;;  %v3097_v15 = vadd.f32 %v2190_v12, %v1828_v26 }
 0x1a1   : > { %v2387_v5 = vmax.f32 %v2355_v24, 0.0  ;;  %v2356_v50 = vadd.f32 %v3096_v57, %v4720_v37 }
 0x1a2   : > { %v2385_v34 = vmax.f32 %v2353_v55, 0.0  ;;  %v2354_v61 = vadd.f32 %v3097_v15, %v4720_v37 }
 0x1a3   : > { %v2800_v8 = vpack.c.bf16 %v2387_v5, %v2387_v5  ;;  %v2388_v27 = vmax.f32 %v2356_v50, 0.0 }
 0x1a4   : > { %v2798_v22 = vpack.c.bf16 %v2385_v34, %v2385_v34  ;;  %v2386_v4 = vmax.f32 %v2354_v61, 0.0  ;;  %v3064_v47 = vpop.f32.mrb[4].mxu0 }
 0x1a5   : > { %2548 = vst.msk [vmem:[%s4728_s10 + $0x8] sm:$0xf] %vm2545_vm12, %v2800_v8  ;;  %v2801_v51 = vpack.c.bf16 %v2388_v27, %v2388_v27  ;;  %v3098_v10 = vadd.f32 %v3064_v47, %v2992_v41  ;;  %v2203_v40 = vpop.f32.mrb[5].mxu0 }
 0x1a6   : > { %2546 = vst.msk [vmem:[%s4728_s10] sm:$0xf] %vm2545_vm12, %v2798_v22  ;;  %v2799_v20 = vpack.c.bf16 %v2386_v4, %v2386_v4  ;;  %v3099_v39 = vadd.f32 %v2203_v40, %v1841_v38  ;;  %v3065_v18 = vpop.f32.mrb[6].mxu0 }
 0x1a7   : > { %2549 = vst.msk [vmem:[%s4728_s10 + $0xc] sm:$0xf] %vm2545_vm12, %v2801_v51  ;;  %v2359_v53 = vadd.f32 %v3098_v10, %v4720_v37  ;;  %v3100_v30 = vadd.f32 %v3065_v18, %v2993_v52  ;;  %v2206_v2 = vpop.f32.mrb[7].mxu0 }
 0x1a8   : > { %2547 = vst.msk [vmem:[%s4728_s10 + $0x4] sm:$0xf] %vm2545_vm12, %v2799_v20  ;;  %v2357_v60 = vadd.f32 %v3099_v39, %v4720_v37  ;;  %v3101_v25 = vadd.f32 %v2206_v2, %v1844_v42 }
 0x1a9   : > { %v2391_v19 = vmax.f32 %v2359_v53, 0.0  ;;  %v2360_v13 = vadd.f32 %v3100_v30, %v4720_v37 }
 0x1aa   : > { %v2389_v3 = vmax.f32 %v2357_v60, 0.0  ;;  %v2358_v31 = vadd.f32 %v3101_v25, %v4720_v37 }
 0x1ab   : > { %v2804_v6 = vpack.c.bf16 %v2391_v19, %v2391_v19  ;;  %v2392_v29 = vmax.f32 %v2360_v13, 0.0 }
 0x1ac   : > { %v2802_v23 = vpack.c.bf16 %v2389_v3, %v2389_v3  ;;  %v2390_v46 = vmax.f32 %v2358_v31, 0.0  ;;  %v3068_v33 = vpop.f32.mrb[8].mxu0 }
 0x1ad   : > { %2552 = vst.msk [vmem:[%s4728_s10 + $0x18] sm:$0xf] %vm2545_vm12, %v2804_v6  ;;  %v2805_v63 = vpack.c.bf16 %v2392_v29, %v2392_v29  ;;  %v3102_v9 = vadd.f32 %v3068_v33, %v2996_v11  ;;  %v2219_v49 = vpop.f32.mrb[9].mxu0 }
 0x1ae   : > { %2550 = vst.msk [vmem:[%s4728_s10 + $0x10] sm:$0xf] %vm2545_vm12, %v2802_v23  ;;  %v2803_v44 = vpack.c.bf16 %v2390_v46, %v2390_v46  ;;  %v3103_v0 = vadd.f32 %v2219_v49, %v1857_v1  ;;  %v3069_v36 = vpop.f32.mrb[10].mxu0 }
 0x1af   : > { %2553 = vst.msk [vmem:[%s4728_s10 + $0x1c] sm:$0xf] %vm2545_vm12, %v2805_v63  ;;  %v2363_v56 = vadd.f32 %v3102_v9, %v4720_v37  ;;  %v3104_v16 = vadd.f32 %v3069_v36, %v4704_v28  ;;  %v2222_v43 = vpop.f32.mrb[11].mxu0 }
 0x1b0   : > { %2551 = vst.msk [vmem:[%s4728_s10 + $0x14] sm:$0xf] %vm2545_vm12, %v2803_v44  ;;  %v2361_v58 = vadd.f32 %v3103_v0, %v4720_v37  ;;  %v3105_v62 = vadd.f32 %v2222_v43, %v4706_v35 }
 0x1b1   : > { %v2395_v26 = vmax.f32 %v2363_v56, 0.0  ;;  %v2364_v41 = vadd.f32 %v3104_v16, %v4720_v37 }
 0x1b2   : > { %v2393_v38 = vmax.f32 %v2361_v58, 0.0  ;;  %v2362_v52 = vadd.f32 %v3105_v62, %v4720_v37 }
 0x1b3   : > { %v2808_v42 = vpack.c.bf16 %v2395_v26, %v2395_v26  ;;  %v2396_v11 = vmax.f32 %v2364_v41, 0.0 }
 0x1b4   : > { %v2806_v1 = vpack.c.bf16 %v2393_v38, %v2393_v38  ;;  %v2394_v28 = vmax.f32 %v2362_v52, 0.0  ;;  %v3072_v48 = vpop.f32.mrb[12].mxu0 }
 0x1b5   : > { %2556 = vst.msk [vmem:[%s4728_s10 + $0x28] sm:$0xf] %vm2545_vm12, %v2808_v42  ;;  %v2809_v17 = vpack.c.bf16 %v2396_v11, %v2396_v11  ;;  %v3106_v32 = vadd.f32 %v3072_v48, %v4708_v45  ;;  %v2235_v21 = vpop.f32.mrb[13].mxu0 }
 0x1b6   : > { %2554 = vst.msk [vmem:[%s4728_s10 + $0x20] sm:$0xf] %vm2545_vm12, %v2806_v1  ;;  %v2807_v35 = vpack.c.bf16 %v2394_v28, %v2394_v28  ;;  %v3107_v14 = vadd.f32 %v2235_v21, %v4710_v7  ;;  %v3073_v24 = vpop.f32.mrb[14].mxu0 }
 0x1b7   : > { %2557 = vst.msk [vmem:[%s4728_s10 + $0x2c] sm:$0xf] %vm2545_vm12, %v2809_v17  ;;  %v2367_v57 = vadd.f32 %v3106_v32, %v4720_v37  ;;  %v3108_v12 = vadd.f32 %v3073_v24, %v4712_v59  ;;  %v2238_v55 = vpop.f32.mrb[15].mxu0 }
 0x1b8   : > { %2555 = vst.msk [vmem:[%s4728_s10 + $0x24] sm:$0xf] %vm2545_vm12, %v2807_v35  ;;  %v2365_v45 = vadd.f32 %v3107_v14, %v4720_v37  ;;  %v3109_v15 = vadd.f32 %v2238_v55, %v4714_v54 }
 0x1b9   : > { %v2399_v5 = vmax.f32 %v2367_v57, 0.0  ;;  %v2368_v50 = vadd.f32 %v3108_v12, %v4720_v37 }
 0x1ba   : > { %v2397_v7 = vmax.f32 %v2365_v45, 0.0  ;;  %v2366_v34 = vadd.f32 %v3109_v15, %v4720_v37 }
 0x1bb   : > { %v2812_v61 = vpack.c.bf16 %v2399_v5, %v2399_v5  ;;  %v2400_v8 = vmax.f32 %v2368_v50, 0.0 }
 0x1bc   : > { %v2810_v27 = vpack.c.bf16 %v2397_v7, %v2397_v7  ;;  %v2398_v59 = vmax.f32 %v2366_v34, 0.0  ;;  %v3076_v22 = vpop.f32.mrb[16].mxu0 }
 0x1bd   : > { %2560 = vst.msk [vmem:[%s4728_s10 + $0x38] sm:$0xf] %vm2545_vm12, %v2812_v61  ;;  %v2813_v4 = vpack.c.bf16 %v2400_v8, %v2400_v8  ;;  %v2251_v51 = vpop.f32.mrb[17].mxu0 }
 0x1be   : > { %2558 = vst.msk [vmem:[%s4728_s10 + $0x30] sm:$0xf] %vm2545_vm12, %v2810_v27  ;;  %v2811_v54 = vpack.c.bf16 %v2398_v59, %v2398_v59  ;;  %v3077_v20 = vpop.f32.mrb[18].mxu0 }
 0x1bf   : > { %v3040_v47 = vpop.f32.mrb[16].mxu1  ;;  %2561 = vst.msk [vmem:[%s4728_s10 + $0x3c] sm:$0xf] %vm2545_vm12, %v2813_v4  ;;  %v2254_v53 = vpop.f32.mrb[19].mxu0 }
 0x1c0   : > { %v3110_v10 = vadd.f32 %v3076_v22, %v3040_v47  ;;  %v2068_v40 = vpop.f32.mrb[17].mxu1  ;;  %2559 = vst.msk [vmem:[%s4728_s10 + $0x34] sm:$0xf] %vm2545_vm12, %v2811_v54 }
 0x1c1   : > { %v3111_v39 = vadd.f32 %v2251_v51, %v2068_v40  ;;  %v3041_v18 = vpop.f32.mrb[18].mxu1 }
 0x1c2   : > { %v2371_v30 = vadd.f32 %v3110_v10, %v4720_v37  ;;  %v3112_v2 = vadd.f32 %v3077_v20, %v3041_v18  ;;  %v2071_v60 = vpop.f32.mrb[19].mxu1 }
 0x1c3   : > { %v2369_v25 = vadd.f32 %v3111_v39, %v4720_v37  ;;  %v3113_v19 = vadd.f32 %v2254_v53, %v2071_v60 }
 0x1c4   : > { %v2403_v13 = vmax.f32 %v2371_v30, 0.0  ;;  %v2372_v3 = vadd.f32 %v3112_v2, %v4720_v37  ;;  %v3080_v46 = vpop.f32.mrb[20].mxu0 }
 0x1c5   : > { %v2401_v31 = vmax.f32 %v2369_v25, 0.0  ;;  %v2370_v6 = vadd.f32 %v3113_v19, %v4720_v37  ;;  %v2267_v49 = vpop.f32.mrb[21].mxu0 }
 0x1c6   : > { %v2816_v29 = vpack.c.bf16 %v2403_v13, %v2403_v13  ;;  %v2404_v23 = vmax.f32 %v2372_v3, 0.0  ;;  %v3081_v56 = vpop.f32.mrb[22].mxu0 }
 0x1c7   : > { %v2814_v33 = vpack.c.bf16 %v2401_v31, %v2401_v31  ;;  %v2402_v63 = vmax.f32 %v2370_v6, 0.0  ;;  %v3044_v9 = vpop.f32.mrb[20].mxu1  ;;  %v2270_v62 = vpop.f32.mrb[23].mxu0 }
 0x1c8   : > { %2564 = vst.msk [vmem:[%s4728_s10 + $0x48] sm:$0xf] %vm2545_vm12, %v2816_v29  ;;  %v2817_v44 = vpack.c.bf16 %v2404_v23, %v2404_v23  ;;  %v3114_v0 = vadd.f32 %v3080_v46, %v3044_v9  ;;  %v2084_v36 = vpop.f32.mrb[21].mxu1 }
 0x1c9   : > { %2562 = vst.msk [vmem:[%s4728_s10 + $0x40] sm:$0xf] %vm2545_vm12, %v2814_v33  ;;  %v2815_v16 = vpack.c.bf16 %v2402_v63, %v2402_v63  ;;  %v3115_v43 = vadd.f32 %v2267_v49, %v2084_v36  ;;  %v3045_v58 = vpop.f32.mrb[22].mxu1 }
 0x1ca   : > { %2565 = vst.msk [vmem:[%s4728_s10 + $0x4c] sm:$0xf] %vm2545_vm12, %v2817_v44  ;;  %v2375_v26 = vadd.f32 %v3114_v0, %v4720_v37  ;;  %v3116_v41 = vadd.f32 %v3081_v56, %v3045_v58  ;;  %v2087_v38 = vpop.f32.mrb[23].mxu1 }
 0x1cb   : > { %2563 = vst.msk [vmem:[%s4728_s10 + $0x44] sm:$0xf] %vm2545_vm12, %v2815_v16  ;;  %v2373_v52 = vadd.f32 %v3115_v43, %v4720_v37  ;;  %v3117_v42 = vadd.f32 %v2270_v62, %v2087_v38 }
 0x1cc   : > { %v2407_v11 = vmax.f32 %v2375_v26, 0.0  ;;  %v2376_v1 = vadd.f32 %v3116_v41, %v4720_v37  ;;  %v3084_v21 = vpop.f32.mrb[24].mxu0 }
 0x1cd   : > { %v2405_v28 = vmax.f32 %v2373_v52, 0.0  ;;  %v2374_v48 = vadd.f32 %v3117_v42, %v4720_v37  ;;  %v2283_v57 = vpop.f32.mrb[25].mxu0 }
 0x1ce   : > { %v2820_v17 = vpack.c.bf16 %v2407_v11, %v2407_v11  ;;  %v2408_v32 = vmax.f32 %v2376_v1, 0.0  ;;  %v3085_v15 = vpop.f32.mrb[26].mxu0 }
 0x1cf   : > { %v2818_v35 = vpack.c.bf16 %v2405_v28, %v2405_v28  ;;  %v2406_v14 = vmax.f32 %v2374_v48, 0.0  ;;  %v3048_v24 = vpop.f32.mrb[24].mxu1  ;;  %v2286_v34 = vpop.f32.mrb[27].mxu0 }
 0x1d0   : > { %2568 = vst.msk [vmem:[%s4728_s10 + $0x58] sm:$0xf] %vm2545_vm12, %v2820_v17  ;;  %v2821_v12 = vpack.c.bf16 %v2408_v32, %v2408_v32  ;;  %v3118_v55 = vadd.f32 %v3084_v21, %v3048_v24  ;;  %v2100_v45 = vpop.f32.mrb[25].mxu1 }
 0x1d1   : > { %2566 = vst.msk [vmem:[%s4728_s10 + $0x50] sm:$0xf] %vm2545_vm12, %v2818_v35  ;;  %v2819_v5 = vpack.c.bf16 %v2406_v14, %v2406_v14  ;;  %v3119_v50 = vadd.f32 %v2283_v57, %v2100_v45  ;;  %v3049_v7 = vpop.f32.mrb[26].mxu1 }
 0x1d2   : > { %2569 = vst.msk [vmem:[%s4728_s10 + $0x5c] sm:$0xf] %vm2545_vm12, %v2821_v12  ;;  %v2379_v61 = vadd.f32 %v3118_v55, %v4720_v37  ;;  %v3120_v8 = vadd.f32 %v3085_v15, %v3049_v7  ;;  %v2103_v27 = vpop.f32.mrb[27].mxu1 }
 0x1d3   : > { %2567 = vst.msk [vmem:[%s4728_s10 + $0x54] sm:$0xf] %vm2545_vm12, %v2819_v5  ;;  %v2377_v59 = vadd.f32 %v3119_v50, %v4720_v37  ;;  %v3121_v22 = vadd.f32 %v2286_v34, %v2103_v27 }
 0x1d4   : > { %v2411_v4 = vmax.f32 %v2379_v61, 0.0  ;;  %v2380_v47 = vadd.f32 %v3120_v8, %v4720_v37  ;;  %v3088_v20 = vpop.f32.mrb[28].mxu0 }
 0x1d5   : > { %v2409_v51 = vmax.f32 %v2377_v59, 0.0  ;;  %v2378_v54 = vadd.f32 %v3121_v22, %v4720_v37  ;;  %v2299_v30 = vpop.f32.mrb[29].mxu0 }
 0x1d6   : > { %v2824_v10 = vpack.c.bf16 %v2411_v4, %v2411_v4  ;;  %v2412_v40 = vmax.f32 %v2380_v47, 0.0  ;;  %v3089_v19 = vpop.f32.mrb[30].mxu0 }
 0x1d7   : > { %v2822_v39 = vpack.c.bf16 %v2409_v51, %v2409_v51  ;;  %v2410_v18 = vmax.f32 %v2378_v54, 0.0  ;;  %v3052_v53 = vpop.f32.mrb[28].mxu1  ;;  %v2302_v6 = vpop.f32.mrb[31].mxu0 }
 0x1d8   : > { %2572 = vst.msk [vmem:[%s4728_s10 + $0x68] sm:$0xf] %vm2545_vm12, %v2824_v10  ;;  %v2825_v2 = vpack.c.bf16 %v2412_v40, %v2412_v40  ;;  %v3122_v60 = vadd.f32 %v3088_v20, %v3052_v53  ;;  %v2116_v25 = vpop.f32.mrb[29].mxu1 }
 0x1d9   : > { %2570 = vst.msk [vmem:[%s4728_s10 + $0x60] sm:$0xf] %vm2545_vm12, %v2822_v39  ;;  %v2823_v13 = vpack.c.bf16 %v2410_v18, %v2410_v18  ;;  %v3123_v3 = vadd.f32 %v2299_v30, %v2116_v25  ;;  %v3053_v31 = vpop.f32.mrb[30].mxu1 }
 0x1da   : > { %2573 = vst.msk [vmem:[%s4728_s10 + $0x6c] sm:$0xf] %vm2545_vm12, %v2825_v2  ;;  %v2383_v29 = vadd.f32 %v3122_v60, %v4720_v37  ;;  %v3124_v23 = vadd.f32 %v3089_v19, %v3053_v31  ;;  %v2119_v46 = vpop.f32.mrb[31].mxu1 }
 0x1db   : > { %2571 = vst.msk [vmem:[%s4728_s10 + $0x64] sm:$0xf] %vm2545_vm12, %v2823_v13  ;;  %v2381_v33 = vadd.f32 %v3123_v3, %v4720_v37  ;;  %v3125_v63 = vadd.f32 %v2302_v6, %v2119_v46 }
 0x1dc   : > { %v2415_v9 = vmax.f32 %v2383_v29, 0.0  ;;  %v2384_v49 = vadd.f32 %v3124_v23, %v4720_v37 }
 0x1dd   : > { %v2413_v44 = vmax.f32 %v2381_v33, 0.0  ;;  %v2382_v0 = vadd.f32 %v3125_v63, %v4720_v37 }
 0x1de   : > { %v2828_v36 = vpack.c.bf16 %v2415_v9, %v2415_v9  ;;  %v2416_v56 = vmax.f32 %v2384_v49, 0.0 }
 0x1df   : > { %v2826_v16 = vpack.c.bf16 %v2413_v44, %v2413_v44  ;;  %v2414_v43 = vmax.f32 %v2382_v0, 0.0 }
 0x1e0   : > { %2576 = vst.msk [vmem:[%s4728_s10 + $0x78] sm:$0xf] %vm2545_vm12, %v2828_v36  ;;  %v2829_v58 = vpack.c.bf16 %v2416_v56, %v2416_v56 }
 0x1e1   : > { %2574 = vst.msk [vmem:[%s4728_s10 + $0x70] sm:$0xf] %vm2545_vm12, %v2826_v16  ;;  %v2827_v37 = vpack.c.bf16 %v2414_v43, %v2414_v43 }
 0x1e2   : > { %2577 = vst.msk [vmem:[%s4728_s10 + $0x7c] sm:$0xf] %vm2545_vm12, %v2829_v58 }
 0x1e3   : > { %2575 = vst.msk [vmem:[%s4728_s10 + $0x74] sm:$0xf] %vm2545_vm12, %v2827_v37 }
 0x1e4   : > { %3456 = shalt.err (!%p3453_p11)
}
 0x1e5   : > { %s3457_s7 = scalar_lea.hbm %s4828_s29, 2048  ;;  %s3461_s11 = scalar_lea.hbm %s4895_s3, 16384 }
 0x1e6   : > { %p3458_p12 = scmp.ne.s32.totalorder %s4828_s29, %s3457_s7  ;;  %p3462_p1 = scmp.lt.u32.totalorder %s4828_s29, %s4895_s3 }
 0x1e7   : > { %p3463_p2 = scmp.lt.u32.totalorder %s3461_s11, %s3457_s7  ;;  %p3465_p5 = scmp.lt.u32.totalorder %s3457_s7, %s4828_s29 }
 0x1e8   : > { %p3459_p13 = pnand %p3458_p12, %p3615_p3 }
 0x1e9   : > { %p3464_p4 = por %p3463_p2, %p3462_p1 }
 0x1ea   : > { %p3460_p0 = pneg %p3459_p13 }
 0x1eb   : > { %p3466_p6 = por %p3465_p5, %p3464_p4 }
 0x1ed   : > { %p3467_p7 = pnand %p3466_p6, %p3460_p0 }
 0x1ef   : > { %3470 = shalt.err (!%p3467_p7)
}
 0x1f0   : > { %s3542_s16 = smov 64   ;;  %s3543_s24 = smov 4  }
 0x1f1   : > { %3162 = dma.vmem_to_hbm [thread:$0]  (%p3615_p3), %s4830_s21, 2048, %s4828_s29, %s4840_s5, %s3542_s16, %s3542_s16, %s3543_s24  }
 0x1f2 PF: > { %p3168_p9 = scmp.ge.s32.totalorder %s3537_s19, 2  ;;  %s2610_s27 = sand.u32 1, %s3509_s12  }
 0x1f3   : > { %s2611_s28 = scalar_lea.sflag [#allocation3], %s2610_s27 }
 0x1f4   : > { %p3165_p10 = pnand %p3168_p9, %p3624_p8 }
 0x1f6   : > { %3504 = dma.done.wait (!%p3165_p10), %s2611_s28, 2048  }
 0x1f7   : > { %3506 = vsyncadd (!%p3165_p10), %s2611_s28, 4294965248  ;;  %s16_s19 = sadd.s32 1, %s3537_s19   ;;  %s4975_s12 = smov %s3513_s13 }
 0x1f8   : > { %p13_p11 = scmp.ge.s32.totalorder %s16_s19, 10   ;;  %s4976_s13 = smov %s3517_s14 }
 0x1f9   : > { %s4977_s14 = smov %s3633_s30  ;;  %s4978_s15 = smov %s3529_s17 }
 0x1fa   : > { %s4979_s16 = smov %s3533_s18  ;;  %s4980_s17 = smov %s4983_s22 }
 0x1fb   : > { %s4981_s18 = smov %s4987_s23  ;;  %15 = sbr.rel (!%p13_p11) target bundleno = 5 (0x5), region = 72 }
 0x202   :  { %2616 = vsyncpa [#allocation3], 1 }
 0x203   :  { %2618 = vsyncpa [#allocation3 + $0x1], 1 }

</bundles_post_ra>
